<compile_context>
chip_gen: v5e
topology: v5e:2x2
jax: 0.10.0
libtpu: 0.0.40
codegen_flags: <defaults>
</compile_context>

<pallas_src>
import functools

import jax
import jax.numpy as jnp
from jax import lax
from jax.experimental import pallas as pl
from jax.experimental.pallas import tpu as pltpu

BN_EPS = 1e-5


# ----------------------------- Pallas kernel --------------------------------
def bottleneck_kernel(xc_ref, xt_ref, xb_ref,
                      w1_ref, s1_ref, b1_ref,
                      w2_ref, s2_ref, b2_ref,
                      w3_ref, s3_ref, b3_ref,
                      o_ref):
    """One (n, h-tile) block: conv1x1 -> BN/ReLU -> conv3x3 -> BN/ReLU -> conv1x1
    -> BN -> +identity -> ReLU, written lane-dense (Cout on the 128-lane axis)."""
    _, TH, W, Cin = xc_ref.shape
    P = w1_ref.shape[1]
    Cout = w3_ref.shape[1]

    h_id = pl.program_id(1)
    last_h = pl.num_programs(1) - 1

    # Hoist per-channel scale/bias + weights once per tile.
    s1 = s1_ref[...]
    b1 = b1_ref[...]
    s2 = s2_ref[...]
    b2 = b2_ref[...]
    s3 = s3_ref[...]
    b3 = b3_ref[...]
    w1 = w1_ref[...]                      # (Cin, P)   bf16
    w2 = w2_ref[...]                      # (9P, P)    bf16, tap-major im2col layout
    w3 = w3_ref[...]                      # (P, Cout)  bf16
    compute_dtype = w1.dtype

    def conv1_bn_relu(x2d):               # x2d: (rows, Cin) f32
        h = jnp.dot(x2d.astype(compute_dtype), w1,
                    preferred_element_type=jnp.float32)
        return jnp.maximum(h * s1 + b1, 0.0)          # f32

    # --- conv1 on the tile's own rows (identity kept in f32 for the residual).
    x_c = xc_ref[0]                                    # (TH, W, Cin) f32
    x_c2d = x_c.reshape(TH * W, Cin)
    h1_c = conv1_bn_relu(x_c2d).reshape(TH, W, P)

    # --- conv1 on the two halo rows (recomputed).  Rows that fall outside the
    # image must be *zero* (conv2's zero padding), so mask the post-BN/ReLU
    # result, not the input.
    top_valid = (h_id > 0).astype(jnp.float32)
    bot_valid = (h_id < last_h).astype(jnp.float32)
    h1_t = conv1_bn_relu(xt_ref[0, 0]) * top_valid     # (W, P)
    h1_b = conv1_bn_relu(xb_ref[0, 0]) * bot_valid     # (W, P)

    # --- assemble zero-padded conv2 input (tile-local, bf16: (TH+2, W+2, P)).
    h1p = jnp.concatenate([h1_t[None], h1_c, h1_b[None]],
                          axis=0).astype(compute_dtype)          # (TH+2, W, P)
    zcol = jnp.zeros((TH + 2, 1, P), compute_dtype)
    h1p = jnp.concatenate([zcol, h1p, zcol], axis=1)             # (TH+2, W+2, P)

    # --- conv2 (3x3) as a single fused im2col matmul: (TH*W, 9P) x (9P, P).
    taps = [h1p[dy:dy + TH, dx:dx + W, :].reshape(TH * W, P)
            for dy in range(3) for dx in range(3)]
    patches = jnp.concatenate(taps, axis=-1)                     # (TH*W, 9P) bf16
    h2 = jnp.dot(patches, w2, preferred_element_type=jnp.float32)
    h2 = jnp.maximum(h2 * s2 + b2, 0.0)

    # --- conv3 (1x1) + BN + residual add + ReLU.
    h3 = jnp.dot(h2.astype(compute_dtype), w3,
                 preferred_element_type=jnp.float32)
    out = jnp.maximum(h3 * s3 + b3 + x_c2d, 0.0)
    o_ref[...] = out.reshape(1, TH, W, Cout).astype(o_ref.dtype)


# ------------------------------- Wrapper -------------------------------------
@functools.partial(jax.jit, static_argnames=("tile_h",))
def bottleneck_forward(x_nhwc, params, *, tile_h=8):
    """x_nhwc: [N, H, W, Cin] float32 (NHWC end-to-end; no layout transposes)."""
    N, H, W, Cin = x_nhwc.shape
    P = params["w1"].shape[1]
    Cout = params["w3"].shape[1]
    assert H % tile_h == 0, "demo wrapper assumes H divisible by tile_h"
    nh = H // tile_h

    def xc_map(n, h):
        return (n, h, 0, 0)

    def xt_map(n, h):                     # row just above the tile (clamped)
        return (n, jnp.maximum(h * tile_h - 1, 0), 0, 0)

    def xb_map(n, h):                     # row just below the tile (clamped)
        return (n, jnp.minimum((h + 1) * tile_h, H - 1), 0, 0)

    def const_map(n, h):                  # weights resident across the grid
        return (0, 0)

    grid_spec = pltpu.PrefetchScalarGridSpec(
        num_scalar_prefetch=0,
        grid=(N, nh),
        in_specs=[
            pl.BlockSpec((1, tile_h, W, Cin), xc_map),   # center rows (+identity)
            pl.BlockSpec((1, 1, W, Cin), xt_map),        # top halo row
            pl.BlockSpec((1, 1, W, Cin), xb_map),        # bottom halo row
            pl.BlockSpec((Cin, P), const_map),           # w1
            pl.BlockSpec((1, P), const_map),             # s1
            pl.BlockSpec((1, P), const_map),             # b1
            pl.BlockSpec((9 * P, P), const_map),         # w2 (im2col packed)
            pl.BlockSpec((1, P), const_map),             # s2
            pl.BlockSpec((1, P), const_map),             # b2
            pl.BlockSpec((P, Cout), const_map),          # w3
            pl.BlockSpec((1, Cout), const_map),          # s3
            pl.BlockSpec((1, Cout), const_map),          # b3
        ],
        out_specs=pl.BlockSpec((1, tile_h, W, Cout), xc_map),
    )

    return pl.pallas_call(
        bottleneck_kernel,
        out_shape=jax.ShapeDtypeStruct((N, H, W, Cout), x_nhwc.dtype),
        grid_spec=grid_spec,
        compiler_params=pltpu.CompilerParams(
            dimension_semantics=("parallel", "parallel"),
            vmem_limit_bytes=32 * 1024 * 1024,
        ),
    )(x_nhwc, x_nhwc, x_nhwc,
      params["w1"], params["s1"], params["b1"],
      params["w2"], params["s2"], params["b2"],
      params["w3"], params["s3"], params["b3"])


# -------------------------- Parameter construction ---------------------------
def make_params(key, in_planes, planes, expansion=4, compute_dtype=jnp.bfloat16):
    """Deterministic synthetic weights + folded (inference-mode) BatchNorm.
    Matmul weights are prepacked in bf16 for the MXU; scale/bias stay f32."""
    out_planes = expansion * planes
    ks = jax.random.split(key, 15)

    def bn_fold(kg, kb, km, kv, c):
        gamma = 0.8 + 0.4 * jax.random.uniform(kg, (1, c), jnp.float32)
        beta = 0.05 * jax.random.normal(kb, (1, c), jnp.float32)
        mean = 0.05 * jax.random.normal(km, (1, c), jnp.float32)
        var = 0.8 + 0.4 * jax.random.uniform(kv, (1, c), jnp.float32)
        scale = gamma / jnp.sqrt(var + BN_EPS)
        bias = beta - mean * scale
        return scale, bias, (gamma, beta, mean, var)

    # HWIO conv weights, scaled to keep activations O(1).
    w1_hwio = (in_planes ** -0.5) * jax.random.normal(
        ks[0], (1, 1, in_planes, planes), jnp.float32)
    w2_hwio = ((9 * planes) ** -0.5) * jax.random.normal(
        ks[1], (3, 3, planes, planes), jnp.float32)
    w3_hwio = (planes ** -0.5) * jax.random.normal(
        ks[2], (1, 1, planes, out_planes), jnp.float32)

    s1, b1, bn1 = bn_fold(ks[3], ks[4], ks[5], ks[6], planes)
    s2, b2, bn2 = bn_fold(ks[7], ks[8], ks[9], ks[10], planes)
    s3, b3, bn3 = bn_fold(ks[11], ks[12], ks[13], ks[14], out_planes)

    params = dict(
        w1=w1_hwio[0, 0].astype(compute_dtype),                       # (Cin, P)
        w2=w2_hwio.reshape(9 * planes, planes).astype(compute_dtype),  # (9P, P)
        w3=w3_hwio[0, 0].astype(compute_dtype),                        # (P, Cout)
        s1=s1, b1=b1, s2=s2, b2=b2, s3=s3, b3=b3,
    )
    ref_params = dict(w1=w1_hwio, w2=w2_hwio, w3=w3_hwio,
                      bn1=bn1, bn2=bn2, bn3=bn3)
    return params, ref_params


# --------------------------- Pure-JAX reference -------------------------------
def reference_forward(x_nhwc, ref_params, matmul_dtype=jnp.float32):
    """NHWC reference. matmul_dtype=bfloat16 reproduces the kernel's precision
    policy (bf16 MXU operands, f32 accumulation, f32 elementwise + identity)."""
    dn = ("NHWC", "HWIO", "NHWC")

    def conv(h, w, padding):
        return lax.conv_general_dilated(
            h.astype(matmul_dtype), w.astype(matmul_dtype), (1, 1), padding,
            dimension_numbers=dn, preferred_element_type=jnp.float32)

    def bn(y, stats):
        gamma, beta, mean, var = stats
        return (y - mean) / jnp.sqrt(var + BN_EPS) * gamma + beta

    h = jnp.maximum(bn(conv(x_nhwc, ref_params["w1"], "VALID"),
                       ref_params["bn1"]), 0.0)
    h = jnp.maximum(bn(conv(h, ref_params["w2"], ((1, 1), (1, 1))),
                       ref_params["bn2"]), 0.0)
    h = bn(conv(h, ref_params["w3"], "VALID"), ref_params["bn3"])
    return jnp.maximum(h + x_nhwc, 0.0)


# ---------------------------------- Main --------------------------------------
if __name__ == "__main__":
    # Bottleneck(in_planes=128, planes=32, stride=1, downsample=None)
    # Cin = Cout = 128 keeps the channel (lane) axis dense and the identity valid.
    N, H, W = 2, 16, 16
    planes, expansion = 32, 4
    in_planes = expansion * planes  # 128

    key = jax.random.PRNGKey(0)
    kx, kp = jax.random.split(key)
    x = jax.random.normal(kx, (N, H, W, in_planes), jnp.float32)   # NHWC
    params, ref_params = make_params(kp, in_planes, planes, expansion)

    out = jax.block_until_ready(bottleneck_forward(x, params))
    assert out.shape == (N, H, W, expansion * planes)

    # Tight check vs. a reference using the same precision policy (bf16 MXU
    # operands, f32 accumulation).
    ref_matched = reference_forward(x, ref_params, matmul_dtype=jnp.bfloat16)
    assert jnp.allclose(out, ref_matched, atol=2e-2, rtol=2e-2), (
        "Pallas Bottleneck does not match matched-precision reference")

    # Loose sanity check vs. the pure-f32 reference (bounds bf16 operand error).
    ref_f32 = reference_forward(x, ref_params, matmul_dtype=jnp.float32)
    assert jnp.allclose(out, ref_f32, atol=1e-1, rtol=1e-1), (
        "Pallas Bottleneck deviates too far from f32 reference")

    print("KERNEL_OK")
</pallas_src>

<mosaic_0001>
module attributes {stable_mosaic.version = 11 : i64} {
  func.func @bottleneck_kernel(%arg0: i32, %arg1: i32, %arg2: memref<1x8x16x128xf32, #tpu.memory_space<vmem>>, %arg3: memref<1x1x16x128xf32, #tpu.memory_space<vmem>>, %arg4: memref<1x1x16x128xf32, #tpu.memory_space<vmem>>, %arg5: memref<128x32xbf16, #tpu.memory_space<vmem>>, %arg6: memref<1x32xf32, #tpu.memory_space<vmem>>, %arg7: memref<1x32xf32, #tpu.memory_space<vmem>>, %arg8: memref<288x32xbf16, #tpu.memory_space<vmem>>, %arg9: memref<1x32xf32, #tpu.memory_space<vmem>>, %arg10: memref<1x32xf32, #tpu.memory_space<vmem>>, %arg11: memref<32x128xbf16, #tpu.memory_space<vmem>>, %arg12: memref<1x128xf32, #tpu.memory_space<vmem>>, %arg13: memref<1x128xf32, #tpu.memory_space<vmem>>, %arg14: memref<1x8x16x128xf32, #tpu.memory_space<vmem>>) attributes {dimension_semantics = [#tpu.dimension_semantics<parallel>, #tpu.dimension_semantics<parallel>], iteration_bounds = array<i64: 2, 2>, scalar_prefetch = 0 : i64, scratch_operands = 0 : i64, tpu.core_type = #tpu.core_type<tc>, window_params = [{transform_indices = @transform_0, window_bounds = array<i64: 1, 8, 16, 128>}, {transform_indices = @transform_1, window_bounds = array<i64: 1, 1, 16, 128>}, {transform_indices = @transform_2, window_bounds = array<i64: 1, 1, 16, 128>}, {pipeline_mode = #tpu.pipeline_mode<synchronous>, transform_indices = @transform_3, window_bounds = array<i64: 128, 32>}, {pipeline_mode = #tpu.pipeline_mode<synchronous>, transform_indices = @transform_4, window_bounds = array<i64: 1, 32>}, {pipeline_mode = #tpu.pipeline_mode<synchronous>, transform_indices = @transform_5, window_bounds = array<i64: 1, 32>}, {pipeline_mode = #tpu.pipeline_mode<synchronous>, transform_indices = @transform_6, window_bounds = array<i64: 288, 32>}, {pipeline_mode = #tpu.pipeline_mode<synchronous>, transform_indices = @transform_7, window_bounds = array<i64: 1, 32>}, {pipeline_mode = #tpu.pipeline_mode<synchronous>, transform_indices = @transform_8, window_bounds = array<i64: 1, 32>}, {pipeline_mode = #tpu.pipeline_mode<synchronous>, transform_indices = @transform_9, window_bounds = array<i64: 32, 128>}, {pipeline_mode = #tpu.pipeline_mode<synchronous>, transform_indices = @transform_10, window_bounds = array<i64: 1, 128>}, {pipeline_mode = #tpu.pipeline_mode<synchronous>, transform_indices = @transform_11, window_bounds = array<i64: 1, 128>}, {transform_indices = @transform_12, window_bounds = array<i64: 1, 8, 16, 128>}]} {
    %c0 = arith.constant 0 : index
    %c0_0 = arith.constant 0 : index
    %0 = vector.load %arg6[%c0, %c0_0] : memref<1x32xf32, #tpu.memory_space<vmem>>, vector<1x32xf32>
    %c0_1 = arith.constant 0 : index
    %c0_2 = arith.constant 0 : index
    %1 = vector.load %arg7[%c0_1, %c0_2] : memref<1x32xf32, #tpu.memory_space<vmem>>, vector<1x32xf32>
    %c0_3 = arith.constant 0 : index
    %c0_4 = arith.constant 0 : index
    %2 = vector.load %arg9[%c0_3, %c0_4] : memref<1x32xf32, #tpu.memory_space<vmem>>, vector<1x32xf32>
    %c0_5 = arith.constant 0 : index
    %c0_6 = arith.constant 0 : index
    %3 = vector.load %arg10[%c0_5, %c0_6] : memref<1x32xf32, #tpu.memory_space<vmem>>, vector<1x32xf32>
    %c0_7 = arith.constant 0 : index
    %c0_8 = arith.constant 0 : index
    %4 = vector.load %arg12[%c0_7, %c0_8] : memref<1x128xf32, #tpu.memory_space<vmem>>, vector<1x128xf32>
    %c0_9 = arith.constant 0 : index
    %c0_10 = arith.constant 0 : index
    %5 = vector.load %arg13[%c0_9, %c0_10] : memref<1x128xf32, #tpu.memory_space<vmem>>, vector<1x128xf32>
    %c0_11 = arith.constant 0 : index
    %c0_12 = arith.constant 0 : index
    %6 = vector.load %arg5[%c0_11, %c0_12] : memref<128x32xbf16, #tpu.memory_space<vmem>>, vector<128x32xbf16>
    %c0_13 = arith.constant 0 : index
    %c0_14 = arith.constant 0 : index
    %7 = vector.load %arg8[%c0_13, %c0_14] : memref<288x32xbf16, #tpu.memory_space<vmem>>, vector<288x32xbf16>
    %c0_15 = arith.constant 0 : index
    %c0_16 = arith.constant 0 : index
    %8 = vector.load %arg11[%c0_15, %c0_16] : memref<32x128xbf16, #tpu.memory_space<vmem>>, vector<32x128xbf16>
    %c0_17 = arith.constant 0 : index
    %c0_18 = arith.constant 0 : index
    %c0_19 = arith.constant 0 : index
    %c0_20 = arith.constant 0 : index
    %9 = vector.load %arg2[%c0_17, %c0_18, %c0_19, %c0_20] : memref<1x8x16x128xf32, #tpu.memory_space<vmem>>, vector<1x8x16x128xf32>
    %10 = vector.shape_cast %9 : vector<1x8x16x128xf32> to vector<8x16x128xf32>
    %11 = vector.shape_cast %10 : vector<8x16x128xf32> to vector<128x128xf32>
    %12 = arith.truncf %11 : vector<128x128xf32> to vector<128x128xbf16>
    %cst = arith.constant dense<0.000000e+00> : vector<128x32xf32>
    %13 = tpu.matmul %12, %6, %cst {dimension_numbers = #tpu.dot_dimension_numbers<[1], [0], [0], [1], [0, 0, 1, 1], [], []>} : vector<128x128xbf16>, vector<128x32xbf16>, vector<128x32xf32> -> vector<128x32xf32>
    %14 = vector.broadcast %0 : vector<1x32xf32> to vector<128x32xf32>
    %15 = arith.mulf %13, %14 : vector<128x32xf32>
    %16 = vector.broadcast %1 : vector<1x32xf32> to vector<128x32xf32>
    %17 = arith.addf %15, %16 : vector<128x32xf32>
    %cst_21 = arith.constant 0.000000e+00 : f32
    %18 = vector.broadcast %cst_21 : f32 to vector<128x32xf32>
    %19 = arith.maximumf %17, %18 : vector<128x32xf32>
    %20 = vector.shape_cast %19 : vector<128x32xf32> to vector<8x16x32xf32>
    %c0_i32 = arith.constant 0 : i32
    %21 = arith.cmpi sgt, %arg1, %c0_i32 : i32
    %22 = arith.extui %21 : i1 to i32
    %23 = arith.sitofp %22 : i32 to f32
    %c1_i32 = arith.constant 1 : i32
    %24 = arith.cmpi slt, %arg1, %c1_i32 : i32
    %25 = arith.extui %24 : i1 to i32
    %26 = arith.sitofp %25 : i32 to f32
    %c0_22 = arith.constant 0 : index
    %c0_23 = arith.constant 0 : index
    %c0_24 = arith.constant 0 : index
    %c0_25 = arith.constant 0 : index
    %27 = vector.load %arg3[%c0_22, %c0_23, %c0_24, %c0_25] : memref<1x1x16x128xf32, #tpu.memory_space<vmem>>, vector<1x1x16x128xf32>
    %28 = vector.shape_cast %27 : vector<1x1x16x128xf32> to vector<16x128xf32>
    %29 = arith.truncf %28 : vector<16x128xf32> to vector<16x128xbf16>
    %cst_26 = arith.constant dense<0.000000e+00> : vector<16x32xf32>
    %30 = tpu.matmul %29, %6, %cst_26 {dimension_numbers = #tpu.dot_dimension_numbers<[1], [0], [0], [1], [0, 0, 1, 1], [], []>} : vector<16x128xbf16>, vector<128x32xbf16>, vector<16x32xf32> -> vector<16x32xf32>
    %31 = vector.broadcast %0 : vector<1x32xf32> to vector<16x32xf32>
    %32 = arith.mulf %30, %31 : vector<16x32xf32>
    %33 = vector.broadcast %1 : vector<1x32xf32> to vector<16x32xf32>
    %34 = arith.addf %32, %33 : vector<16x32xf32>
    %cst_27 = arith.constant 0.000000e+00 : f32
    %35 = vector.broadcast %cst_27 : f32 to vector<16x32xf32>
    %36 = arith.maximumf %34, %35 : vector<16x32xf32>
    %37 = vector.broadcast %23 : f32 to vector<16x32xf32>
    %38 = arith.mulf %36, %37 : vector<16x32xf32>
    %c0_28 = arith.constant 0 : index
    %c0_29 = arith.constant 0 : index
    %c0_30 = arith.constant 0 : index
    %c0_31 = arith.constant 0 : index
    %39 = vector.load %arg4[%c0_28, %c0_29, %c0_30, %c0_31] : memref<1x1x16x128xf32, #tpu.memory_space<vmem>>, vector<1x1x16x128xf32>
    %40 = vector.shape_cast %39 : vector<1x1x16x128xf32> to vector<16x128xf32>
    %41 = arith.truncf %40 : vector<16x128xf32> to vector<16x128xbf16>
    %cst_32 = arith.constant dense<0.000000e+00> : vector<16x32xf32>
    %42 = tpu.matmul %41, %6, %cst_32 {dimension_numbers = #tpu.dot_dimension_numbers<[1], [0], [0], [1], [0, 0, 1, 1], [], []>} : vector<16x128xbf16>, vector<128x32xbf16>, vector<16x32xf32> -> vector<16x32xf32>
    %43 = vector.broadcast %0 : vector<1x32xf32> to vector<16x32xf32>
    %44 = arith.mulf %42, %43 : vector<16x32xf32>
    %45 = vector.broadcast %1 : vector<1x32xf32> to vector<16x32xf32>
    %46 = arith.addf %44, %45 : vector<16x32xf32>
    %cst_33 = arith.constant 0.000000e+00 : f32
    %47 = vector.broadcast %cst_33 : f32 to vector<16x32xf32>
    %48 = arith.maximumf %46, %47 : vector<16x32xf32>
    %49 = vector.broadcast %26 : f32 to vector<16x32xf32>
    %50 = arith.mulf %48, %49 : vector<16x32xf32>
    %51 = vector.shape_cast %38 : vector<16x32xf32> to vector<1x16x32xf32>
    %52 = vector.shape_cast %50 : vector<16x32xf32> to vector<1x16x32xf32>
    %53 = tpu.concatenate %51, %20, %52 in 0 : vector<1x16x32xf32>, vector<8x16x32xf32>, vector<1x16x32xf32> -> vector<10x16x32xf32>
    %54 = arith.truncf %53 : vector<10x16x32xf32> to vector<10x16x32xbf16>
    %cst_34 = arith.constant 0.000000e+00 : bf16
    %55 = vector.broadcast %cst_34 : bf16 to vector<10x1x32xbf16>
    %56 = tpu.concatenate %55, %54, %55 in 1 : vector<10x1x32xbf16>, vector<10x16x32xbf16>, vector<10x1x32xbf16> -> vector<10x18x32xbf16>
    %57 = vector.extract_strided_slice %56 {offsets = [0, 0, 0], sizes = [8, 16, 32], strides = [1, 1, 1]} : vector<10x18x32xbf16> to vector<8x16x32xbf16>
    %58 = vector.shape_cast %57 : vector<8x16x32xbf16> to vector<128x32xbf16>
    %59 = vector.extract_strided_slice %56 {offsets = [0, 1, 0], sizes = [8, 16, 32], strides = [1, 1, 1]} : vector<10x18x32xbf16> to vector<8x16x32xbf16>
    %60 = vector.shape_cast %59 : vector<8x16x32xbf16> to vector<128x32xbf16>
    %61 = vector.extract_strided_slice %56 {offsets = [0, 2, 0], sizes = [8, 16, 32], strides = [1, 1, 1]} : vector<10x18x32xbf16> to vector<8x16x32xbf16>
    %62 = vector.shape_cast %61 : vector<8x16x32xbf16> to vector<128x32xbf16>
    %63 = vector.extract_strided_slice %56 {offsets = [1, 0, 0], sizes = [8, 16, 32], strides = [1, 1, 1]} : vector<10x18x32xbf16> to vector<8x16x32xbf16>
    %64 = vector.shape_cast %63 : vector<8x16x32xbf16> to vector<128x32xbf16>
    %65 = vector.extract_strided_slice %56 {offsets = [1, 1, 0], sizes = [8, 16, 32], strides = [1, 1, 1]} : vector<10x18x32xbf16> to vector<8x16x32xbf16>
    %66 = vector.shape_cast %65 : vector<8x16x32xbf16> to vector<128x32xbf16>
    %67 = vector.extract_strided_slice %56 {offsets = [1, 2, 0], sizes = [8, 16, 32], strides = [1, 1, 1]} : vector<10x18x32xbf16> to vector<8x16x32xbf16>
    %68 = vector.shape_cast %67 : vector<8x16x32xbf16> to vector<128x32xbf16>
    %69 = vector.extract_strided_slice %56 {offsets = [2, 0, 0], sizes = [8, 16, 32], strides = [1, 1, 1]} : vector<10x18x32xbf16> to vector<8x16x32xbf16>
    %70 = vector.shape_cast %69 : vector<8x16x32xbf16> to vector<128x32xbf16>
    %71 = vector.extract_strided_slice %56 {offsets = [2, 1, 0], sizes = [8, 16, 32], strides = [1, 1, 1]} : vector<10x18x32xbf16> to vector<8x16x32xbf16>
    %72 = vector.shape_cast %71 : vector<8x16x32xbf16> to vector<128x32xbf16>
    %73 = vector.extract_strided_slice %56 {offsets = [2, 2, 0], sizes = [8, 16, 32], strides = [1, 1, 1]} : vector<10x18x32xbf16> to vector<8x16x32xbf16>
    %74 = vector.shape_cast %73 : vector<8x16x32xbf16> to vector<128x32xbf16>
    %75 = tpu.concatenate %58, %60, %62, %64, %66, %68, %70, %72, %74 in 1 : vector<128x32xbf16>, vector<128x32xbf16>, vector<128x32xbf16>, vector<128x32xbf16>, vector<128x32xbf16>, vector<128x32xbf16>, vector<128x32xbf16>, vector<128x32xbf16>, vector<128x32xbf16> -> vector<128x288xbf16>
    %cst_35 = arith.constant dense<0.000000e+00> : vector<128x32xf32>
    %76 = tpu.matmul %75, %7, %cst_35 {dimension_numbers = #tpu.dot_dimension_numbers<[1], [0], [0], [1], [0, 0, 1, 1], [], []>} : vector<128x288xbf16>, vector<288x32xbf16>, vector<128x32xf32> -> vector<128x32xf32>
    %77 = vector.broadcast %2 : vector<1x32xf32> to vector<128x32xf32>
    %78 = arith.mulf %76, %77 : vector<128x32xf32>
    %79 = vector.broadcast %3 : vector<1x32xf32> to vector<128x32xf32>
    %80 = arith.addf %78, %79 : vector<128x32xf32>
    %cst_36 = arith.constant 0.000000e+00 : f32
    %81 = vector.broadcast %cst_36 : f32 to vector<128x32xf32>
    %82 = arith.maximumf %80, %81 : vector<128x32xf32>
    %83 = arith.truncf %82 : vector<128x32xf32> to vector<128x32xbf16>
    %cst_37 = arith.constant dense<0.000000e+00> : vector<128x128xf32>
    %84 = tpu.matmul %83, %8, %cst_37 {dimension_numbers = #tpu.dot_dimension_numbers<[1], [0], [0], [1], [0, 0, 1, 1], [], []>} : vector<128x32xbf16>, vector<32x128xbf16>, vector<128x128xf32> -> vector<128x128xf32>
    %85 = vector.broadcast %4 : vector<1x128xf32> to vector<128x128xf32>
    %86 = arith.mulf %84, %85 : vector<128x128xf32>
    %87 = vector.broadcast %5 : vector<1x128xf32> to vector<128x128xf32>
    %88 = arith.addf %86, %87 : vector<128x128xf32>
    %89 = arith.addf %88, %11 : vector<128x128xf32>
    %cst_38 = arith.constant 0.000000e+00 : f32
    %90 = vector.broadcast %cst_38 : f32 to vector<128x128xf32>
    %91 = arith.maximumf %89, %90 : vector<128x128xf32>
    %92 = vector.shape_cast %91 : vector<128x128xf32> to vector<1x8x16x128xf32>
    %c0_39 = arith.constant 0 : index
    %c0_40 = arith.constant 0 : index
    %c0_41 = arith.constant 0 : index
    %c0_42 = arith.constant 0 : index
    %93 = vector.load %arg14[%c0_39, %c0_40, %c0_41, %c0_42] : memref<1x8x16x128xf32, #tpu.memory_space<vmem>>, vector<1x8x16x128xf32>
    tpu.vector_store %arg14[%c0_39, %c0_40, %c0_41, %c0_42], %92 {strides = array<i32>} : memref<1x8x16x128xf32, #tpu.memory_space<vmem>>, vector<1x8x16x128xf32>,
    return
  }
  func.func @transform_0(%arg0: i32, %arg1: i32) -> (i32, i32, i32, i32) {
    %c0_i32 = arith.constant 0 : i32
    %c0_i32_0 = arith.constant 0 : i32
    %c0_i32_1 = arith.constant 0 : i32
    return %arg0, %arg1, %c0_i32, %c0_i32_0 : i32, i32, i32, i32
  }
  func.func @transform_1(%arg0: i32, %arg1: i32) -> (i32, i32, i32, i32) {
    %c8_i32 = arith.constant 8 : i32
    %0 = arith.muli %arg1, %c8_i32 : i32
    %c1_i32 = arith.constant 1 : i32
    %1 = arith.subi %0, %c1_i32 : i32
    %c0_i32 = arith.constant 0 : i32
    %2 = arith.maxsi %1, %c0_i32 : i32
    %c0_i32_0 = arith.constant 0 : i32
    %c0_i32_1 = arith.constant 0 : i32
    %c0_i32_2 = arith.constant 0 : i32
    return %arg0, %2, %c0_i32_0, %c0_i32_1 : i32, i32, i32, i32
  }
  func.func @transform_2(%arg0: i32, %arg1: i32) -> (i32, i32, i32, i32) {
    %c1_i32 = arith.constant 1 : i32
    %0 = arith.addi %arg1, %c1_i32 : i32
    %c8_i32 = arith.constant 8 : i32
    %1 = arith.muli %0, %c8_i32 : i32
    %c15_i32 = arith.constant 15 : i32
    %2 = arith.minsi %1, %c15_i32 : i32
    %c0_i32 = arith.constant 0 : i32
    %c0_i32_0 = arith.constant 0 : i32
    %c0_i32_1 = arith.constant 0 : i32
    return %arg0, %2, %c0_i32, %c0_i32_0 : i32, i32, i32, i32
  }
  func.func @transform_3(%arg0: i32, %arg1: i32) -> (i32, i32) {
    %c0_i32 = arith.constant 0 : i32
    %c0_i32_0 = arith.constant 0 : i32
    %c0_i32_1 = arith.constant 0 : i32
    return %c0_i32, %c0_i32_0 : i32, i32
  }
  func.func @transform_4(%arg0: i32, %arg1: i32) -> (i32, i32) {
    %c0_i32 = arith.constant 0 : i32
    %c0_i32_0 = arith.constant 0 : i32
    %c0_i32_1 = arith.constant 0 : i32
    return %c0_i32, %c0_i32_0 : i32, i32
  }
  func.func @transform_5(%arg0: i32, %arg1: i32) -> (i32, i32) {
    %c0_i32 = arith.constant 0 : i32
    %c0_i32_0 = arith.constant 0 : i32
    %c0_i32_1 = arith.constant 0 : i32
    return %c0_i32, %c0_i32_0 : i32, i32
  }
  func.func @transform_6(%arg0: i32, %arg1: i32) -> (i32, i32) {
    %c0_i32 = arith.constant 0 : i32
    %c0_i32_0 = arith.constant 0 : i32
    %c0_i32_1 = arith.constant 0 : i32
    return %c0_i32, %c0_i32_0 : i32, i32
  }
  func.func @transform_7(%arg0: i32, %arg1: i32) -> (i32, i32) {
    %c0_i32 = arith.constant 0 : i32
    %c0_i32_0 = arith.constant 0 : i32
    %c0_i32_1 = arith.constant 0 : i32
    return %c0_i32, %c0_i32_0 : i32, i32
  }
  func.func @transform_8(%arg0: i32, %arg1: i32) -> (i32, i32) {
    %c0_i32 = arith.constant 0 : i32
    %c0_i32_0 = arith.constant 0 : i32
    %c0_i32_1 = arith.constant 0 : i32
    return %c0_i32, %c0_i32_0 : i32, i32
  }
  func.func @transform_9(%arg0: i32, %arg1: i32) -> (i32, i32) {
    %c0_i32 = arith.constant 0 : i32
    %c0_i32_0 = arith.constant 0 : i32
    %c0_i32_1 = arith.constant 0 : i32
    return %c0_i32, %c0_i32_0 : i32, i32
  }
  func.func @transform_10(%arg0: i32, %arg1: i32) -> (i32, i32) {
    %c0_i32 = arith.constant 0 : i32
    %c0_i32_0 = arith.constant 0 : i32
    %c0_i32_1 = arith.constant 0 : i32
    return %c0_i32, %c0_i32_0 : i32, i32
  }
  func.func @transform_11(%arg0: i32, %arg1: i32) -> (i32, i32) {
    %c0_i32 = arith.constant 0 : i32
    %c0_i32_0 = arith.constant 0 : i32
    %c0_i32_1 = arith.constant 0 : i32
    return %c0_i32, %c0_i32_0 : i32, i32
  }
  func.func @transform_12(%arg0: i32, %arg1: i32) -> (i32, i32, i32, i32) {
    %c0_i32 = arith.constant 0 : i32
    %c0_i32_0 = arith.constant 0 : i32
    %c0_i32_1 = arith.constant 0 : i32
    return %arg0, %arg1, %c0_i32, %c0_i32_0 : i32, i32, i32, i32
  }
}

</mosaic_0001>

<bundles_post_ra>
// kernel: bottleneck_forward.1
= control target key start
LH: loop header
LB: loop body
LE: loop exit
PB: predicated region body
PF: predicated region fallthrough
CT: control target
= control target key end

     0   :  { %s3723_s0 = inlined_call_operand.hbm [shape: f32[2,16,16,128], index: 0, kind: input, shape index: {}, may-alias: {0,1,2}]   ;;  %s3724_s1 = inlined_call_operand.hbm [shape: f32[2,16,16,128], index: 1, kind: input, shape index: {}, may-alias: {0,1,2}]   ;;  %s3725_s2 = inlined_call_operand.hbm [shape: f32[2,16,16,128], index: 2, kind: input, shape index: {}, may-alias: {0,1,2}]   ;;  %s3726_s3 = inlined_call_operand.vmem [shape: bf16[128,32], index: 3, kind: input, shape index: {}]   ;;  %s3727_s4 = inlined_call_operand.vmem [shape: f32[1,32], index: 4, kind: input, shape index: {}]   ;;  %s3728_s5 = inlined_call_operand.vmem [shape: f32[1,32], index: 5, kind: input, shape index: {}]   ;;  %s3729_s6 = inlined_call_operand.vmem [shape: bf16[288,32], index: 6, kind: input, shape index: {}]   ;;  %s3730_s7 = inlined_call_operand.vmem [shape: f32[1,32], index: 7, kind: input, shape index: {}]   ;;  %s3731_s8 = inlined_call_operand.vmem [shape: f32[1,32], index: 8, kind: input, shape index: {}]   ;;  %s3732_s9 = inlined_call_operand.vmem [shape: bf16[32,128], index: 9, kind: input, shape index: {}]   ;;  %s3733_s10 = inlined_call_operand.vmem [shape: f32[1,128], index: 10, kind: input, shape index: {}]   ;;  %s3734_s11 = inlined_call_operand.vmem [shape: f32[1,128], index: 11, kind: input, shape index: {}]   ;;  %s3735_s12 = inlined_call_operand.hbm [shape: f32[2,16,16,128], index: 12, kind: output, shape index: {}]  }
   0x1   :  { %3756 = sst [smem:[#allocation26_spill]] %s3723_s0 }
   0x2   :  { %3757 = sst [smem:[#allocation27_spill]] %s3724_s1 }
   0x3   :  { %3758 = sst [smem:[#allocation28_spill]] %s3726_s3 }
   0x4   :  { %3759 = sst [smem:[#allocation29_spill]] %s3727_s4 }
   0x5   :  { %3760 = sst [smem:[#allocation30_spill]] %s3728_s5 }
   0x6   :  { %3761 = sst [smem:[#allocation31_spill]] %s3729_s6 }
   0x7   :  { %3762 = sst [smem:[#allocation32_spill]] %s3730_s7 }
   0x8   :  { %3763 = sst [smem:[#allocation33_spill]] %s3731_s8 }
   0x9   :  { %3764 = sst [smem:[#allocation34_spill]] %s3732_s9 }
   0xa   :  { %3765 = sst [smem:[#allocation35_spill]] %s3733_s10 }
   0xb   :  { %3766 = sst [smem:[#allocation36_spill]] %s3734_s11 }
   0xc   :  { %3767 = sst [smem:[#allocation37_spill]] %s3735_s12 }
   0xd   :  { %17 = vsyncpa [#allocation3], 0 }
   0xe   :  { %19 = vsyncpa [#allocation3 + $0x1], 0 }
   0xf   :  { %20 = vsyncpa [#allocation6], 0 }
  0x10   :  { %22 = vsyncpa [#allocation6 + $0x1], 0 }
  0x11   :  { %23 = vsyncpa [#allocation4], 0 }
  0x12   :  { %25 = vsyncpa [#allocation4 + $0x1], 0  ;;  %s2817_s21 = smov 0   ;;  %s2819_s22 = smov 0  }
  0x13   :  { %s2821_s23 = smov 0   ;;  %s2823_s24 = smov 0  }
  0x14   :  { %s2825_s25 = smov 0   ;;  %s2827_s26 = smov 0  }
  0x15   :  { %s2829_s27 = smov 0   ;;  %s2831_s28 = smov 0  }
  0x16   :  { %s2833_s29 = smov 0   ;;  %s2835_s30 = smov 0  }
  0x17   :  { %s2837_s13 = smov 0   ;;  %s2839_s14 = smov 0  }
  0x18   :  { %s2841_s15 = smov 0   ;;  %s2843_s16 = smov 0  }
  0x19 LB: > { %3768 = sst [smem:[#allocation13_spill]] %s2711_s26  ;;  %s2888_s17 = sadd.s32 4294967295, %s2743_s16   ;;  %s2743_s16 = sphi %s2843_s16, %s31_s16   ;;  %s2739_s15 = sphi %s2841_s15, %s3823_s15   ;;  %s2735_s14 = sphi %s2839_s14, %s3822_s14   ;;  %s2731_s13 = sphi %s2837_s13, %s3821_s13   ;;  %s2727_s30 = sphi %s2835_s30, %s3820_s30   ;;  %s2723_s29 = sphi %s2833_s29, %s3831_s29   ;;  %s2719_s28 = sphi %s2831_s28, %s3830_s28   ;;  %s2715_s27 = sphi %s2829_s27, %s3829_s27   ;;  %s2711_s26 = sphi %s2827_s26, %s3817_s26   ;;  %s2707_s25 = sphi %s2825_s25, %s3828_s25   ;;  %s2703_s24 = sphi %s2823_s24, %s3827_s24   ;;  %s2699_s23 = sphi %s2821_s23, %s3826_s23   ;;  %s2695_s22 = sphi %s2819_s22, %s3825_s22   ;;  %s2691_s21 = sphi %s2817_s21, %s3824_s21  }
  0x1a   : > { %3769 = sst [smem:[#allocation14_spill]] %s2715_s27  ;;  %s40_s18 = sadd.s32 1, %s2735_s14 }
  0x1b   : > { %3770 = sst [smem:[#allocation15_spill]] %s2723_s29  ;;  %p41_p0 = scmp.ge.s32.totalorder %s40_s18, 2 }
  0x1c   : > { %3771 = sst [smem:[#allocation16_spill]] %s2727_s30  ;;  %s43_s19 = sadd.s32 1, %s2739_s15 }
  0x1d   : > { %3772 = sst [smem:[#allocation17_spill]] %s2731_s13  ;;  %p60_p1 = scmp.eq.s32.totalorder %s2743_s16, 0 }
  0x1e   : > { %3773 = sst [smem:[#allocation18_spill]] %s2735_s14  ;;  %p66_p2 = scmp.eq.s32.totalorder %s2888_s17, 0 }
  0x1f   : > { %3774 = sst [smem:[#allocation19_spill]] %s2739_s15  ;;  %s3833_s18 = smov (%p41_p0, %s40_s18), 0 }
  0x20   : > { %3775 = sst [smem:[#allocation20_spill]] %s3833_s18  ;;  %s3835_s19 = smov (!%p41_p0, %s43_s19), %s2739_s15 }
  0x21   : > { %s48_s20 = ssub.s32 %s2735_s14, %s3833_s18  ;;  %s2118_s12 = sshll.u32 %s2735_s14, 3 }
  0x22   : > { %p45_p3 = scmp.ge.s32.totalorder %s3835_s19, 2  ;;  %s2119_s13 = sadd.s32 4294967295, %s2118_s12 }
  0x23   : > { %p77_p4 = scmp.gt.s32.totalorder %s2119_s13, 0  ;;  %s2120_s11 = sshll.u32 %s3833_s18, 3 }
  0x24   : > { %s3837_s19 = smov (%p45_p3, %s3835_s19), 0  ;;  %s2121_s8 = sadd.s32 4294967295, %s2120_s11 }
  0x25   : > { %3776 = sst [smem:[#allocation21_spill]] %s3837_s19  ;;  %s3839_s13 = smov (!%p77_p4, %s2119_s13), 0 }
  0x26   : > { %s2905_s10 = ssub.s32 %s2739_s15, %s3837_s19  ;;  %p81_p5 = scmp.gt.s32.totalorder %s2121_s8, 0 }
  0x27   : > { %s2908_s7 = sor.u32 %s48_s20, %s2905_s10  ;;  %s88_s9 = sadd.s32 1, %s2711_s26 }
  0x28   : > { %p50_p6 = scmp.eq.s32.totalorder %s2908_s7, 0  ;;  %s3841_s8 = smov (!%p81_p5, %s2121_s8), 0 }
  0x29   : > { %p95_p7 = scmp.ne.s32.totalorder %s2711_s26, %s2707_s25  ;;  %p101_p8 = scmp.ne.s32.totalorder %s2707_s25, %s2703_s24 }
  0x2a   : > { %s84_s18 = ssub.s32 %s3839_s13, %s3841_s8  ;;  %s2916_s19 = sadd.s32 8, %s2118_s12 }
  0x2b   : > { %s85_s6 = sor.u32 %s84_s18, %s2905_s10  ;;  %p2921_p9 = por %p95_p7, %p60_p1 }
  0x2c   : > { %p86_p10 = scmp.eq.s32.totalorder %s85_s6, 0  ;;  %p2927_p11 = por %p101_p8, %p66_p2 }
  0x2d   : > { %s2932_s24 = sadd.s32 8, %s2120_s11  ;;  %p3754_p0 = scmp.lt.s32.totalorder %s2743_s16, 4 }
  0x2e   : > { %s3778_s5 = scalar_select %p2927_p11, 1, 0 }
  0x2f   : > { %s2935_s8 = scalar_select %p86_p10, %s2711_s26, %s88_s9  }
  0x30   : > { %3779 = sst [smem:[#allocation22_spill]] %s3778_s5  ;;  %s2940_s12 = sshll.u32 %s2739_s15, 5 }
  0x31   : > { %3780 = sst [smem:[#allocation23_spill]] %s2935_s8  ;;  %s430_s6 = sand.u32 1, %s2743_s16  }
  0x32   : > { %s432_s18 = sand.u32 1, %s2711_s26   ;;  %s2134_s30 = sshll.u32 %s3839_s13, 1 }
  0x33   : > { %s2131_s4 = sshll.u32 %s432_s18, 4  ;;  %s443_s3 = sadd.s32 %s2134_s30, %s2940_s12 }
  0x34   : > { %s434_s5 = scalar_lea.vmem [#allocation5], %s2131_s4  ;;  %s2136_s9 = sshll.u32 %s443_s3, 3 }
  0x35   : > { %s448_s11 = sshll.u32 %s434_s5, 4  ;;  %s3781_s1 = sld [smem:[#allocation27_spill]]  ;;  %s449_s11 = int_to_ptr.vmem [resolvable:$true] %s448_s11 }
  0x36   : > { %p2346_p3 = pnand %p3754_p0, %p2921_p9  ;;  %p2142_p4 = scmp.ge.s32.totalorder %s2743_s16, 1 }
  0x37   : > { %s2953_s4 = scalar_lea.sflag [#allocation6], %s430_s6  ;;  %s3747_s3 = smov 128  }
  0x38   : > { %s3749_s5 = smov 8   ;;  %p484_p5 = scmp.lt.s32.totalorder %s2743_s16, 5 }
  0x39   : > { %s52_s15 = sadd.s32 1, %s2723_s29  ;;  %p59_p8 = scmp.ne.s32.totalorder %s2723_s29, %s2719_s28 }
  0x3a   : > { %p2960_p7 = pnand %p2142_p4, %p484_p5  ;;  %p65_p9 = scmp.ne.s32.totalorder %s2719_s28, %s2715_s27 }
  0x3b   : > { %s445_s26 = scalar_lea.hbm %s3781_s1, %s2136_s9  ;;  %p352_p10 = scmp.eq.s32.totalorder %s2888_s17, 3 }
  0x3c   : > { %s446_s30 = sshll.u32 %s445_s26, 4  ;;  %s2117_s26 = sadd.s32 4294967294, %s2743_s16   ;;  %s447_s30 = int_to_ptr.hbm [resolvable:$true] %s446_s30 }
  0x3d   : > { %2348 = dma.hbm_to_vmem [thread:$0]  (!%p2346_p3), %s447_s30, 256, %s449_s11, %s2953_s4, %s3747_s3, %s3747_s3, %s3749_s5  }
  0x3e   : > { %s2969_s20 = scalar_select %p50_p6, %s2723_s29, %s52_s15  }
  0x3f   : > { %p358_p13 = scmp.eq.s32.totalorder %s2117_s26, 3  ;;  %p2978_p12 = por %p60_p1, %p59_p8 }
  0x40   : > { %3783 = sst [smem:[#allocation24_spill]] %s2969_s20  ;;  %p2984_p3 = por %p66_p2, %p65_p9 }
  0x41   : > { %p2988_p4 = por %p352_p10, %p59_p8  ;;  %p2992_p6 = por %p358_p13, %p65_p9 }
  0x42   : > { %s405_s11 = sand.u32 1, %s2723_s29   ;;  %s2286_s9 = sshll.u32 %s2735_s14, 4 }
  0x43   : > { %s3787_s18 = scalar_select %p2992_p6, 1, 0 }
  0x44   : > { %s2126_s30 = sshll.u32 %s405_s11, 7  ;;  %s415_s26 = sadd.s32 %s2286_s9, %s2940_s12 }
  0x45   : > { %3788 = sst [smem:[#allocation25_spill]] %s3787_s18  ;;  %s2130_s15 = sshll.u32 %s415_s26, 3 }
  0x46   : > { %s409_s3 = scalar_lea.vmem [#allocation2], %s2126_s30  ;;  %s3789_s0 = sld [smem:[#allocation26_spill]] }
  0x47   : > { %s420_s5 = sshll.u32 %s409_s3, 4  ;;  %p2343_p13 = pnand %p3754_p0, %p2978_p12  ;;  %s421_s5 = int_to_ptr.vmem [resolvable:$true] %s420_s5 }
  0x48   : > { %s406_s9 = scalar_lea.sflag [#allocation3], %s405_s11  ;;  %s3790_s14 = smov 8  }
  0x49   : > { %s3791_s26 = smov 128   ;;  %p3792_p5 = scmp.lt.s32.totalorder %s2916_s19, 15 }
  0x4a   : > { %p3793_p8 = scmp.lt.s32.totalorder %s2932_s24, 15  ;;  %s124_s1 = sadd.s32 1, %s2699_s23 }
  0x4b   : > { %s3843_s19 = smov (!%p3792_p5, %s2916_s19), 15  ;;  %p131_p9 = scmp.ne.s32.totalorder %s2699_s23, %s2695_s22 }
  0x4c   : > { %s417_s18 = scalar_lea.hbm %s3789_s0, %s2130_s15  ;;  %s3845_s24 = smov (!%p3793_p8, %s2932_s24), 15 }
  0x4d   : > { %s418_s29 = sshll.u32 %s417_s18, 4  ;;  %s120_s3 = ssub.s32 %s3843_s19, %s3845_s24  ;;  %s419_s29 = int_to_ptr.hbm [resolvable:$true] %s418_s29 }
  0x4e   : > { %2345 = dma.hbm_to_vmem [thread:$0]  (!%p2343_p13), %s419_s29, 2048, %s421_s5, %s406_s9, %s3791_s26, %s3791_s26, %s3790_s14  }
  0x4f   : > { %p137_p10 = scmp.ne.s32.totalorder %s2695_s22, %s2691_s21  ;;  %s121_s20 = sor.u32 %s120_s3, %s2905_s10 }
  0x50   : > { %p3023_p12 = por %p131_p9, %p60_p1  ;;  %p122_p0 = scmp.eq.s32.totalorder %s121_s20, 0 }
  0x51   : > { %p3029_p13 = por %p137_p10, %p66_p2  ;;  %s460_s5 = sand.u32 1, %s2699_s23  }
  0x52   : > { %s2139_s18 = sshll.u32 %s3843_s19, 1  ;;  %s2137_s21 = sshll.u32 %s460_s5, 4 }
  0x53   : > { %s3035_s11 = scalar_select %p122_p0, %s2699_s23, %s124_s1  }
  0x54   : > { %s471_s10 = sadd.s32 %s2139_s18, %s2940_s12  ;;  %s462_s3 = scalar_lea.vmem [#allocation7], %s2137_s21 }
  0x55   : > { %s2141_s24 = sshll.u32 %s471_s10, 3  ;;  %s476_s0 = sshll.u32 %s462_s3, 4  ;;  %s477_s0 = int_to_ptr.vmem [resolvable:$true] %s476_s0 }
  0x56   : > { %s473_s9 = scalar_lea.hbm %s3725_s2, %s2141_s24  ;;  %p3796_p1 = scmp.lt.s32.totalorder %s2743_s16, 4 }
  0x57   : > { %s474_s27 = sshll.u32 %s473_s9, 4  ;;  %488 = sbr.rel (%p2960_p7) target bundleno = 836 (0x344), region = 68  ;;  %s475_s27 = int_to_ptr.hbm [resolvable:$true] %s474_s27 }
  0x58   : > { %p2349_p2 = pnand %p3796_p1, %p3023_p12  ;;  %s3052_s19 = sand.u32 (!%p2960_p7), 1, %s2719_s28  }
  0x59   : > { %s2143_s12 = sshll.u32 (!%p2960_p7), %s3052_s19, 7  ;;  %s491_s1 = scalar_lea.sflag (!%p2960_p7), [#allocation3], %s3052_s19 }
  0x5a   : > { %2351 = dma.hbm_to_vmem [thread:$0]  (!%p2349_p2), %s475_s27, 256, %s477_s0, %s2953_s4, %s3791_s26, %s3791_s26, %s3790_s14  }
  0x5b   : > { %s3058_s20 = scalar_lea.vmem (!%p2960_p7), [#allocation2], %s2143_s12 }
  0x5c   : > { %2674 = dma.done.wait (%p2984_p3), %s491_s1, 2048  }
  0x5d   : > { %2676 = vsyncadd (%p2984_p3), %s491_s1, 4294965248  ;;  %s500_s27 = sand.u32 1, %s2888_s17   ;;  %s502_s14 = sand.u32 1, %s2707_s25  }
  0x5e   : > { %s3066_s4 = sshll.u32 %s502_s14, 4  ;;  %s501_s13 = scalar_lea.sflag [#allocation6], %s500_s27 }
  0x5f   : > { %s504_s26 = scalar_lea.vmem [#allocation5], %s3066_s4 }
  0x60   : > { %2678 = dma.done.wait (%p2927_p11), %s501_s13, 256  }
  0x61   : > { %2680 = vsyncadd (%p2927_p11), %s501_s13, 4294967040  ;;  %s512_s8 = sand.u32 1, %s2695_s22  }
  0x62   : > { %s3074_s6 = sshll.u32 %s512_s8, 4 }
  0x63   : > { %s514_s5 = scalar_lea.vmem [#allocation7], %s3074_s6 }
  0x64   : > { %2682 = dma.done.wait (%p3029_p13), %s501_s13, 256  }
  0x65   : > { %2684 = vsyncadd (%p3029_p13), %s501_s13, 4294967040  ;;  %s3798_s21 = sld [smem:[#allocation28_spill]]  ;;  %v639_v8 = vld [vmem:[%s3058_s20] sm:$0xff]  ;;  %v640_v9 = vld [vmem:[%s3058_s20 + $0x8] sm:$0xff]  ;;  %vm1032_vm0 = vcmask 1040384   ;;  %s2747_s14 = smov 96  }
  0x66   : > { %v820_v10 = vld [vmem:[%s504_s26] sm:$0xff]  ;;  %v821_v11 = vld [vmem:[%s504_s26 + $0x8] sm:$0xff]  ;;  %v655_v12 = vpack.c.bf16 %v640_v9, %v639_v8  ;;  %s3800_s4 = sld [smem:[#allocation16_spill]]  ;;  %vm1033_vm1 = vsmask.f32 256  ;;  %vm1168_vm3 = vcmask 1046528  }
  0x67   : > { %v822_v13 = vpack.c.bf16 %v821_v11, %v820_v10  ;;  %v645_v14 = vld [vmem:[%s3058_s20 + $0x30] sm:$0xff]  ;;  %v646_v15 = vld [vmem:[%s3058_s20 + $0x38] sm:$0xff]  ;;  %v647_v23 = vld [vmem:[%s3058_s20 + $0x40] sm:$0xff]  ;;  %s3801_s24 = sld [smem:[#allocation29_spill]]  ;;  %s2748_s13 = smov 32   ;;  %vm1323_vm5 = vcmask 261120  }
  0x68   : > { %v658_v16 = vpack.c.bf16 %v646_v15, %v645_v14  ;;  %v649_v17 = vld [vmem:[%s3058_s20 + $0x50] sm:$0xff]  ;;  %v650_v18 = vld [vmem:[%s3058_s20 + $0x58] sm:$0xff]  ;;  %v648_v24 = vld [vmem:[%s3058_s20 + $0x48] sm:$0xff]  ;;  %s3802_s9 = sld [smem:[#allocation30_spill]]  ;;  %vm1055_vm4 = vsmask.f32 7424 }
  0x69   : > { %v660_v19 = vpack.c.bf16 %v650_v18, %v649_v17  ;;  %v641_v20 = vld [vmem:[%s3058_s20 + $0x10] sm:$0xff]  ;;  %v642_v21 = vld [vmem:[%s3058_s20 + $0x18] sm:$0xff]  ;;  %v651_v25 = vld [vmem:[%s3058_s20 + $0x60] sm:$0xff]  ;;  %v659_v27 = vpack.c.bf16 %v648_v24, %v647_v23  ;;  %s3803_s1 = sld [smem:[#allocation31_spill]]  ;;  %s2749_s8 = smov 64   ;;  %vm1340_vm6 = vcmask 523264  }
  0x6a   : > { %v656_v22 = vpack.c.bf16 %v642_v21, %v641_v20  ;;  %v652_v26 = vld [vmem:[%s3058_s20 + $0x68] sm:$0xff]  ;;  %v643_v29 = vld [vmem:[%s3058_s20 + $0x20] sm:$0xff]  ;;  %v653_v34 = vld [vmem:[%s3058_s20 + $0x70] sm:$0xff]  ;;  %vm1357_vm7 = vcmask 785408   ;;  %s3807_s29 = sld [smem:[#allocation32_spill]]  ;;  %s1959_s17 = scalar_lea.sflag [#allocation4], %s3052_s19 }
  0x6b   : > { %s3799_s10 = smov %s3798_s21  ;;  %v2296_v0 = vld [vmem:[%s3798_s21 + $0x38] sm:$0xff]  ;;  %v661_v28 = vpack.c.bf16 %v652_v26, %v651_v25  ;;  %v644_v30 = vld [vmem:[%s3058_s20 + $0x28] sm:$0xff]  ;;  %v846_v32 = vld [vmem:[%s514_s5] sm:$0xff]  ;;  %s3808_s27 = sld [smem:[#allocation33_spill]] }
  0x6c   : > { %711 = vmatpush.bf16.msra.mxu0 %v2296_v0  ;;  %823 = vmatpush.bf16.msra.mxu1 %v2296_v0  ;;  %v2295_v1 = vld [vmem:[%s3799_s10 + $0x30] sm:$0xff]  ;;  %v2294_v2 = vld [vmem:[%s3799_s10 + $0x28] sm:$0xff]  ;;  %v2293_v3 = vld [vmem:[%s3799_s10 + $0x20] sm:$0xff]  ;;  %v657_v31 = vpack.c.bf16 %v644_v30, %v643_v29  ;;  %p814_p11 = scmp.gt.s32.totalorder %s3800_s4, 0  ;;  %p817_p0 = scmp.lt.s32.totalorder %s3800_s4, 1 }
  0x6d   : > { %2318 = vmatpush.bf16.msra.mxu2 %v2296_v0  ;;  %2319 = vmatpush.bf16.msra.mxu3 %v2296_v0  ;;  %v2292_v4 = vld [vmem:[%s3799_s10 + $0x18] sm:$0xff]  ;;  %v2291_v5 = vld [vmem:[%s3799_s10 + $0x10] sm:$0xff]  ;;  %v2290_v6 = vld [vmem:[%s3799_s10 + $0x8] sm:$0xff]  ;;  %s3809_s26 = sld [smem:[#allocation35_spill]] }
  0x6e   : > { %v2289_v7 = vld [vmem:[%s3799_s10] sm:$0xff]  ;;  %v847_v33 = vld [vmem:[%s514_s5 + $0x8] sm:$0xff]  ;;  %s815_s6 = scalar_select %p814_p11, 1, 0  ;;  %vm3157_vm2 = vmand %vm1032_vm0, %vm1033_vm1 }
  0x6f   : > { %v654_v35 = vld [vmem:[%s3058_s20 + $0x78] sm:$0xff]  ;;  %v848_v36 = vpack.c.bf16 %v847_v33, %v846_v32  ;;  %v3133_v38 = vld [vmem:[%s3801_s24] ss:$0 sm:$0xff]  ;;  %v2314_v48 = vld [vmem:[%s3803_s1 + $0x88] sm:$0xff]  ;;  %s818_s15 = scalar_select %p817_p0, 1, 0 }
  0x70   : > { %712 = vmatpush.bf16.msra.mxu0 %v2295_v1  ;;  %824 = vmatpush.bf16.msra.mxu1 %v2295_v1  ;;  %v662_v37 = vpack.c.bf16 %v654_v35, %v653_v34  ;;  %v3138_v39 = vld [vmem:[%s3802_s9] ss:$0 sm:$0xff]  ;;  %s816_s5 = scvt.s32.f32 %s815_s6  ;;  %s3810_s30 = sld [smem:[#allocation36_spill]] }
  0x71   : > { %2320 = vmatpush.bf16.msra.mxu2 %v2295_v1  ;;  %2321 = vmatpush.bf16.msra.mxu3 %v2295_v1  ;;  %v2313_v58 = vld [vmem:[%s3803_s1 + $0x80] sm:$0xff]  ;;  %s819_s3 = scvt.s32.f32 %s818_s15 }
  0x72   : > { %v843_v49 = vstv %s816_s5 }
  0x74   : > { %713 = vmatpush.bf16.msra.mxu0 %v2294_v2  ;;  %825 = vmatpush.bf16.msra.mxu1 %v2294_v2 }
  0x75   : > { %2322 = vmatpush.bf16.msra.mxu2 %v2294_v2  ;;  %2323 = vmatpush.bf16.msra.mxu3 %v2294_v2 }
  0x78   : > { %714 = vmatpush.bf16.msra.mxu0 %v2293_v3  ;;  %826 = vmatpush.bf16.msra.mxu1 %v2293_v3 }
  0x79   : > { %2324 = vmatpush.bf16.msra.mxu2 %v2293_v3  ;;  %2325 = vmatpush.bf16.msra.mxu3 %v2293_v3 }
  0x7c   : > { %715 = vmatpush.bf16.msra.mxu0 %v2292_v4  ;;  %827 = vmatpush.bf16.msra.mxu1 %v2292_v4 }
  0x7d   : > { %2326 = vmatpush.bf16.msra.mxu2 %v2292_v4  ;;  %2327 = vmatpush.bf16.msra.mxu3 %v2292_v4 }
  0x80   : > { %716 = vmatpush.bf16.msra.mxu0 %v2291_v5  ;;  %828 = vmatpush.bf16.msra.mxu1 %v2291_v5 }
  0x81   : > { %2328 = vmatpush.bf16.msra.mxu2 %v2291_v5  ;;  %2329 = vmatpush.bf16.msra.mxu3 %v2291_v5 }
  0x84   : > { %717 = vmatpush.bf16.msra.mxu0 %v2290_v6  ;;  %829 = vmatpush.bf16.msra.mxu1 %v2290_v6 }
  0x85   : > { %2330 = vmatpush.bf16.msra.mxu2 %v2290_v6  ;;  %2331 = vmatpush.bf16.msra.mxu3 %v2290_v6 }
  0x88   : > { %718 = vmatpush.bf16.msra.mxu0 %v2289_v7  ;;  %830 = vmatpush.bf16.msra.mxu1 %v2289_v7 }
  0x89   : > { %2332 = vmatpush.bf16.msra.mxu2 %v2289_v7  ;;  %2333 = vmatpush.bf16.msra.mxu3 %v2289_v7 }
  0x8b   : > { %719 = vmatmul.bf16.vlgmr.msra.gmra.mxu0 %v655_v12  ;;  %831 = vmatmul.bf16.vlgmr.msra.gmra.mxu1 %v822_v13 }
  0x8c   : > { %734 = vmatmul.bf16.vlgmr.msra.gmra.mxu2 %v658_v16  ;;  %744 = vmatmul.bf16.vlgmr.msra.gmra.mxu3 %v660_v19 }
  0x8d   : > { %849 = vmatpush.bf16.msrb.mxu2 %v2296_v0 }
  0x91   : > { %850 = vmatpush.bf16.msrb.mxu2 %v2295_v1 }
  0x95   : > { %851 = vmatpush.bf16.msrb.mxu2 %v2294_v2 }
  0x99   : > { %852 = vmatpush.bf16.msrb.mxu2 %v2293_v3 }
  0x9b   : > { %724 = vmatmul.bf16.gmra.mxu0 %v656_v22 }
  0x9c   : > { %739 = vmatmul.bf16.gmra.mxu2 %v659_v27  ;;  %749 = vmatmul.bf16.gmra.mxu3 %v661_v28 }
  0x9d   : > { %853 = vmatpush.bf16.msrb.mxu2 %v2292_v4 }
  0xa1   : > { %854 = vmatpush.bf16.msrb.mxu2 %v2291_v5 }
  0xa5   : > { %855 = vmatpush.bf16.msrb.mxu2 %v2290_v6 }
  0xa9   : > { %856 = vmatpush.bf16.msrb.mxu2 %v2289_v7 }
  0xab   : > { %729 = vmatmul.bf16.gmra.mxu0 %v657_v31 }
  0xac   : > { %857 = vmatmul.bf16.vlgmr.msrb.gmra.mxu2 %v848_v36  ;;  %754 = vmatmul.bf16.gmra.mxu3 %v662_v37 }
  0xad   : > { %1682 = vmatpush.bf16.msra.mxu2 %v2314_v48 }
  0xb1   : > { %1683 = vmatpush.bf16.msra.mxu2 %v2313_v58 }
 0x108   : > { %v720_v40 = vpop.f32.mrf.mxu0  ;;  %v832_v41 = vpop.f32.mrf.mxu1 }
 0x109   : > { %v763_v42 = vmul.f32 %v3133_v38, %v720_v40  ;;  %v837_v43 = vmul.f32 %v3133_v38, %v832_v41 }
 0x10b   : > { %v782_v44 = vadd.f32 %v3138_v39, %v763_v42  ;;  %v839_v45 = vadd.f32 %v3138_v39, %v837_v43 }
 0x10d   : > { %v798_v46 = vmax.f32 %v782_v44, 0.0  ;;  %v841_v47 = vmax.f32 %v839_v45, 0.0 }
 0x10f   : > { %v874_v54 = vpack.c.bf16 %v798_v46, %v798_v46  ;;  %v844_v55 = vmul.f32 %v843_v49, %v841_v47  ;;  %v735_v61 = vpop.f32.mrf.mxu2 }
 0x110   : > { %v722_v50 = vpop.f32.mrf.mxu0  ;;  %v834_v51 = vpop.f32.mrf.mxu1  ;;  %v769_v23 = vmul.f32 %v3133_v38, %v735_v61 }
 0x111   : > { %v764_v52 = vmul.f32 %v3133_v38, %v722_v50  ;;  %v838_v53 = vmul.f32 %v3133_v38, %v834_v51  ;;  %v914_v62 = vunpack.c.l.b16 %v874_v54  ;;  %v872_v63 = vpack.c.bf16 %v844_v55, %v844_v55 }
 0x112   : > { %v788_v33 = vadd.f32 %v3138_v39, %v769_v23 }
 0x113   : > { %v783_v56 = vadd.f32 %v3138_v39, %v764_v52  ;;  %v840_v57 = vadd.f32 %v3138_v39, %v838_v53  ;;  %v912_v6 = vunpack.c.l.b16 %v872_v63 }
 0x114   : > { %v804_v48 = vmax.f32 %v788_v33, 0.0 }
 0x115   : > { %v799_v59 = vmax.f32 %v783_v56, 0.0  ;;  %v842_v60 = vmax.f32 %v840_v57, 0.0 }
 0x116   : > { %v880_v61 = vpack.c.bf16 %v804_v48, %v804_v48 }
 0x117   : > { %v875_v0 = vpack.c.bf16 %v799_v59, %v799_v59  ;;  %v845_v1 = vmul.f32 %v843_v49, %v842_v60  ;;  %v737_v17 = vpop.f32.mrf.mxu2 }
 0x118   : > { %v725_v2 = vpop.f32.mrf.mxu0  ;;  %v770_v34 = vmul.f32 %v3133_v38, %v737_v17 }
 0x119   : > { %v915_v3 = vunpack.c.l.b16 %v875_v0  ;;  %v873_v4 = vpack.c.bf16 %v845_v1, %v845_v1  ;;  %v765_v5 = vmul.f32 %v3133_v38, %v725_v2 }
 0x11a   : > { %v789_v49 = vadd.f32 %v3138_v39, %v770_v34 }
 0x11b   : > { %v933_v7 = vpack.c.b16 %v915_v3, %v914_v62  ;;  %v913_v8 = vunpack.c.l.b16 %v873_v4  ;;  %v784_v9 = vadd.f32 %v3138_v39, %v765_v5 }
 0x11c   : > { %v805_v57 = vmax.f32 %v789_v49, 0.0 }
 0x11d   : > { %v950_v10 = vshrl.u32 %v933_v7, 16  ;;  %v932_v11 = vpack.c.b16 %v913_v8, %v912_v6  ;;  %v953_v13 = vshll.u32 %v933_v7, 16  ;;  %v800_v14 = vmax.f32 %v784_v9, 0.0 }
 0x11e   : > { %v881_v5 = vpack.c.bf16 %v805_v57, %v805_v57  ;;  %v920_v9 = vunpack.c.l.b16 %v880_v61 }
 0x11f   : > { %v952_v12 = vrot.slane %v950_v10, 7  ;;  %v943_v15 = vshrl.u32 %v932_v11, 16  ;;  %v946_v20 = vshll.u32 %v932_v11, 16  ;;  %v876_v24 = vpack.c.bf16 %v800_v14, %v800_v14  ;;  %v740_v50 = vpop.f32.mrf.mxu2  ;;  %v3207_v11 = vpop.f32.mrf.mxu3 }
 0x120   : > { %v727_v16 = vpop.f32.mrf.mxu0  ;;  %v921_v23 = vunpack.c.l.b16 %v881_v5 }
 0x121   : > { %v766_v18 = vmul.f32 %v3133_v38, %v727_v16  ;;  %v955_v19 = vor.u32 %v953_v13, %v952_v12  ;;  %v945_v22 = vrot.slane %v943_v15, 7  ;;  %v3175_v30 = vsel %vm3157_vm2, %v952_v12, 0 }
 0x122   : > { %v916_v35 = vunpack.c.l.b16 %v876_v24  ;;  %v1173_v42 = vrot.slane %v3175_v30, 1  ;;  %v1076_v6 = vshll.u32 %v3175_v30, 16 }
 0x123   : > { %v785_v25 = vadd.f32 %v3138_v39, %v766_v18  ;;  %v3165_v26 = vsel %vm3157_vm2, 0, %v955_v19  ;;  %v948_v27 = vor.u32 %v946_v20, %v945_v22  ;;  %v3171_v28 = vsel %vm3157_vm2, %v945_v22, 0 }
 0x124   : > { %1259 = vrot.lane.b32.xlu1 %v3165_v26, %s2747_s14  ;;  %v1172_v31 = vrot.slane %v3165_v26, 1  ;;  %v1064_v40 = vshll.u32 %v3171_v28, 16  ;;  %v1071_v3 = vshll.u32 %v3165_v26, 16  ;;  %v1170_v4 = vrot.slane %v3171_v28, 1 }
 0x125   : > { %v801_v29 = vmax.f32 %v785_v25, 0.0  ;;  %v3180_v32 = vsel %vm3157_vm2, 0, %v948_v27  ;;  %v1069_v19 = vshrl.u32 %v3165_v26, 16 }
 0x126   : > { %v1059_v37 = vshll.u32 %v3180_v32, 16  ;;  %v1057_v45 = vshrl.u32 %v3180_v32, 16  ;;  %v1174_v47 = vsel %vm1168_vm3, %v1172_v31, %v1173_v42  ;;  %v1066_v54 = vrot.slane %v1064_v40, 1 }
 0x127   : > { %v877_v36 = vpack.c.bf16 %v801_v29, %v801_v29  ;;  %v1169_v63 = vrot.slane %v3180_v32, 1  ;;  %v742_v16 = vpop.f32.mrf.mxu2  ;;  %v1073_v20 = vrot.slane %v1071_v3, 1  ;;  %v771_v29 = vmul.f32 %v3133_v38, %v740_v50 }
 0x128   : > { %v730_v41 = vpop.f32.mrf.mxu0  ;;  %v1061_v46 = vrot.slane %v1059_v37, 1  ;;  %v772_v30 = vmul.f32 %v3133_v38, %v742_v16 }
 0x129   : > { %v917_v43 = vunpack.c.l.b16 %v877_v36  ;;  %v767_v44 = vmul.f32 %v3133_v38, %v730_v41  ;;  %v1171_v18 = vsel %vm1168_vm3, %v1169_v63, %v1170_v4  ;;  %v936_v36 = vpack.c.b16 %v921_v23, %v920_v9 }
 0x12a   : > { %v1062_v53 = vor.u32 %v1061_v46, %v1057_v45  ;;  %v1078_v41 = vrot.slane %v1076_v6, 1  ;;  %v790_v42 = vadd.f32 %v3138_v39, %v771_v29  ;;  %v747_v46 = vpop.f32.mrf.mxu3  ;;  %v773_v4 = vmul.f32 %v3133_v38, %v3207_v11 }
 0x12b   : > { %v934_v51 = vpack.c.b16 %v917_v43, %v916_v35  ;;  %v786_v52 = vadd.f32 %v3138_v39, %v767_v44  ;;  %v1074_v35 = vor.u32 %v1073_v20, %v1069_v19  ;;  %v791_v43 = vadd.f32 %v3138_v39, %v772_v30 }
 0x12c   : > { %1275 = vrot.lane.b32.xlu1 %v1174_v47, %s2748_s13  ;;  %v1067_v56 = vsel %vm1055_vm4, %v1062_v53, %v1066_v54  ;;  %v806_v50 = vmax.f32 %v790_v42, 0.0  ;;  %v974_v54 = vshll.u32 %v936_v36, 16  ;;  %v774_v9 = vmul.f32 %v3133_v38, %v747_v46  ;;  %v2304_v42 = vld [vmem:[%s3803_s1 + $0x38] sm:$0xff] }
 0x12d   : > { %v957_v55 = vshrl.u32 %v934_v51, 16  ;;  %1227 = vrot.lane.b32.xlu0 %v1067_v56, %s2748_s13  ;;  %v960_v59 = vshll.u32 %v934_v51, 16  ;;  %v802_v60 = vmax.f32 %v786_v52, 0.0  ;;  %v3230_v45 = vsel %vm1055_vm4, %v1074_v35, %v1078_v41  ;;  %1578 = vmatpush.bf16.msrb.mxu3 %v2304_v42  ;;  %v2308_v42 = vld [vmem:[%s3803_s1 + $0x58] sm:$0xff] }
 0x12e   : > { %v807_v51 = vmax.f32 %v791_v43, 0.0  ;;  %v882_v56 = vpack.c.bf16 %v806_v50, %v806_v50 }
 0x12f   : > { %v959_v58 = vrot.slane %v957_v55, 7  ;;  %v878_v7 = vpack.c.bf16 %v802_v60, %v802_v60 }
 0x130   : > { %v732_v62 = vpop.f32.mrf.mxu0  ;;  %v922_v3 = vunpack.c.l.b16 %v882_v56 }
 0x131   : > { %v962_v0 = vor.u32 %v960_v59, %v959_v58  ;;  %v1047_v1 = vsel %vm3157_vm2, %v959_v58, 0  ;;  %v768_v2 = vmul.f32 %v3133_v38, %v732_v62  ;;  %v918_v27 = vunpack.c.l.b16 %v878_v7 }
 0x132   : > { %v1176_v13 = vrot.slane %v1047_v1, 1  ;;  %v1088_v15 = vshll.u32 %v1047_v1, 16  ;;  %v883_v58 = vpack.c.bf16 %v807_v51, %v807_v51  ;;  %v750_v5 = vpop.f32.mrf.mxu3 }
 0x133   : > { %v787_v8 = vadd.f32 %v3138_v39, %v768_v2  ;;  %v3205_v10 = vsel %vm3157_vm2, 0, %v962_v0  ;;  %v775_v35 = vmul.f32 %v3133_v38, %v750_v5 }
 0x134   : > { %1291 = vrot.lane.b32.xlu2 %v3205_v10, %s2749_s8  ;;  %1245 = vrot.lane.b32.xlu1 %v1174_v47, %s2749_s8  ;;  %v1175_v12 = vrot.slane %v3205_v10, 1  ;;  %v1083_v14 = vshll.u32 %v3205_v10, 16  ;;  %v1081_v24 = vshrl.u32 %v3205_v10, 16  ;;  %v1090_v33 = vrot.slane %v1088_v15, 1 }
 0x135   : > { %v803_v17 = vmax.f32 %v787_v8, 0.0  ;;  %1243 = vrot.lane.b32.xlu0 %v1171_v18, %s2749_s8  ;;  %v971_v47 = vshrl.u32 %v936_v36, 16  ;;  %v923_v6 = vunpack.c.l.b16 %v883_v58  ;;  %v793_v15 = vadd.f32 %v3138_v39, %v774_v9  ;;  %v2302_v9 = vld [vmem:[%s3803_s1 + $0x28] sm:$0xff] }
 0x136   : > { %v1177_v22 = vsel %vm1168_vm3, %v1175_v12, %v1176_v13  ;;  %v1085_v25 = vrot.slane %v1083_v14, 1  ;;  %v792_v14 = vadd.f32 %v3138_v39, %v773_v4 }
 0x137   : > { %v879_v28 = vpack.c.bf16 %v803_v17, %v803_v17  ;;  %2251 = vmatmul.msk.bf16.vlgmr.msra.gmra.mxu2 %vm1323_vm5, %v1177_v22  ;;  %v973_v55 = vrot.slane %v971_v47, 7  ;;  %v937_v13 = vpack.c.b16 %v923_v6, %v922_v3  ;;  %v809_v20 = vmax.f32 %v793_v15, 0.0 }
 0x138   : > { %v1086_v31 = vor.u32 %v1085_v25, %v1081_v24  ;;  %v808_v19 = vmax.f32 %v792_v14, 0.0  ;;  %v794_v47 = vadd.f32 %v3138_v39, %v775_v35 }
 0x139   : > { %v919_v34 = vunpack.c.l.b16 %v879_v28  ;;  %v976_v2 = vor.u32 %v974_v54, %v973_v55  ;;  %v1049_v16 = vsel %vm3157_vm2, %v973_v55, 0  ;;  %v978_v18 = vshrl.u32 %v937_v13, 16  ;;  %v2303_v54 = vld [vmem:[%s3803_s1 + $0x30] sm:$0xff]  ;;  %v2312_v55 = vld [vmem:[%s3803_s1 + $0x78] sm:$0xff] }
 0x13a   : > { %v3223_v37 = vsel %vm1055_vm4, %v1086_v31, %v1090_v33  ;;  %v1182_v24 = vrot.slane %v1049_v16, 1  ;;  %v1112_v28 = vshll.u32 %v1049_v16, 16  ;;  %v981_v30 = vshll.u32 %v937_v13, 16  ;;  %1579 = vmatpush.bf16.msrb.mxu3 %v2303_v54  ;;  %1627 = vmatpush.bf16.msrb.mxu1 %v2312_v55  ;;  %v2311_v13 = vld [vmem:[%s3803_s1 + $0x70] sm:$0xff] }
 0x13b   : > { %v935_v40 = vpack.c.b16 %v919_v34, %v918_v27  ;;  %v3262_v11 = vsel %vm3157_vm2, 0, %v976_v2  ;;  %v980_v29 = vrot.slane %v978_v18, 7  ;;  %v884_v31 = vpack.c.bf16 %v808_v19, %v808_v19  ;;  %v858_v18 = vpop.f32.mrf.mxu2 }
 0x13c   : > { %1307 = vrot.lane.b32.xlu2 %v3223_v37, %s2747_s14  ;;  %v1107_v17 = vshll.u32 %v3262_v11, 16  ;;  %v1181_v23 = vrot.slane %v3262_v11, 1  ;;  %v1105_v25 = vshrl.u32 %v3262_v11, 16  ;;  %v885_v33 = vpack.c.bf16 %v809_v20, %v809_v20 }
 0x13d   : > { %v964_v44 = vshrl.u32 %v935_v40, 16  ;;  %1229 = vrot.lane.b32.xlu0 %v3230_v45, %s2748_s13  ;;  %v967_v49 = vshll.u32 %v935_v40, 16  ;;  %v1114_v40 = vrot.slane %v1112_v28, 1  ;;  %v983_v43 = vor.u32 %v981_v30, %v980_v29  ;;  %v2309_v30 = vld [vmem:[%s3803_s1 + $0x60] sm:$0xff] }
 0x13e   : > { %v1109_v27 = vrot.slane %v1107_v17, 1  ;;  %v1183_v34 = vsel %vm1168_vm3, %v1181_v23, %v1182_v24  ;;  %v925_v46 = vunpack.c.l.b16 %v885_v33  ;;  %v1050_v56 = vsel %vm3157_vm2, %v980_v29, 0  ;;  %1580 = vmatpush.bf16.msrb.mxu3 %v2302_v9  ;;  %1628 = vmatpush.bf16.msrb.mxu1 %v2311_v13  ;;  %v2301_v23 = vld [vmem:[%s3803_s1 + $0x20] sm:$0xff]  ;;  %v2298_v13 = vld [vmem:[%s3803_s1 + $0x8] sm:$0xff] }
 0x13f   : > { %v966_v48 = vrot.slane %v964_v44, 7  ;;  %v924_v44 = vunpack.c.l.b16 %v884_v31  ;;  %v1124_v3 = vshll.u32 %v1050_v56, 16  ;;  %v2300_v31 = vld [vmem:[%s3803_s1 + $0x18] sm:$0xff]  ;;  %v863_v55 = vmul.f32 %v3133_v38, %v858_v18 }
 0x140   : > { %v1110_v36 = vor.u32 %v1109_v27, %v1105_v25  ;;  %v869_v9 = vstv %s819_s3 }
 0x141   : > { %v969_v52 = vor.u32 %v967_v49, %v966_v48  ;;  %v1048_v53 = vsel %vm3157_vm2, %v966_v48, 0  ;;  %v938_v51 = vpack.c.b16 %v925_v46, %v924_v44  ;;  %v1126_v16 = vrot.slane %v1124_v3, 1  ;;  %v2306_v3 = vld [vmem:[%s3803_s1 + $0x48] sm:$0xff] }
 0x142   : > { %v1179_v60 = vrot.slane %v1048_v53, 1  ;;  %v1100_v62 = vshll.u32 %v1048_v53, 16  ;;  %v3286_v48 = vsel %vm1055_vm4, %v1110_v36, %v1114_v40  ;;  %v810_v53 = vmax.f32 %v794_v47, 0.0  ;;  %1581 = vmatpush.bf16.msrb.mxu3 %v2301_v23 }
 0x143   : > { %v3238_v57 = vsel %vm3157_vm2, 0, %v969_v52  ;;  %v3294_v52 = vsel %vm3157_vm2, 0, %v983_v43  ;;  %v988_v5 = vshll.u32 %v938_v51, 16 }
 0x144   : > { %1261 = vrot.lane.b32.xlu2 %v3205_v10, %s2747_s14  ;;  %1293 = vrot.lane.b32.xlu1 %v3238_v57, %s2749_s8  ;;  %v1178_v59 = vrot.slane %v3238_v57, 1  ;;  %v1095_v61 = vshll.u32 %v3238_v57, 16  ;;  %v1093_v0 = vshrl.u32 %v3238_v57, 16  ;;  %v1102_v8 = vrot.slane %v1100_v62, 1 }
 0x145   : > { %1277 = vrot.lane.b32.xlu0 %v1177_v22, %s2748_s13  ;;  %v1184_v62 = vrot.slane %v3294_v52, 1 }
 0x146   : > { %v1180_v63 = vsel %vm1168_vm3, %v1178_v59, %v1179_v60  ;;  %v1097_v1 = vrot.slane %v1095_v61, 1  ;;  %v1119_v59 = vshll.u32 %v3294_v52, 16  ;;  %v985_v60 = vshrl.u32 %v938_v51, 16  ;;  %1582 = vmatpush.bf16.msrb.mxu3 %v2300_v31 }
 0x147   : > { %2252 = vmatmul.msk.bf16.gmra.mxu2 %vm1323_vm5, %v1180_v63  ;;  %v886_v61 = vpack.c.bf16 %v810_v53, %v810_v53 }
 0x148   : > { %v1098_v7 = vor.u32 %v1097_v1, %v1093_v0  ;;  %v1117_v1 = vshrl.u32 %v3294_v52, 16  ;;  %v1121_v2 = vrot.slane %v1119_v59, 1  ;;  %v987_v4 = vrot.slane %v985_v60, 7  ;;  %v2307_v59 = vld [vmem:[%s3803_s1 + $0x50] sm:$0xff] }
 0x14a   : > { %v3254_v12 = vsel %vm1055_vm4, %v1098_v7, %v1102_v8  ;;  %v926_v7 = vunpack.c.l.b16 %v886_v61  ;;  %v1122_v15 = vor.u32 %v1121_v2, %v1117_v1  ;;  %v990_v19 = vor.u32 %v988_v5, %v987_v4 }
 0x14b   : > { %v1051_v35 = vsel %vm3157_vm2, %v987_v4, 0  ;;  %v865_v1 = vadd.f32 %v3138_v39, %v863_v55 }
 0x14c   : > { %1309 = vrot.lane.b32.xlu2 %v3254_v12, %s2747_s14  ;;  %1247 = vrot.lane.b32.xlu1 %v1177_v22, %s2749_s8  ;;  %v752_v22 = vpop.f32.mrf.mxu3  ;;  %v3334_v25 = vsel %vm1055_vm4, %v1122_v15, %v1126_v16  ;;  %v3342_v28 = vsel %vm3157_vm2, 0, %v990_v19  ;;  %v1188_v46 = vrot.slane %v1051_v35, 1  ;;  %v1136_v53 = vshll.u32 %v1051_v35, 16  ;;  %v2305_v15 = vld [vmem:[%s3803_s1 + $0x40] sm:$0xff] }
 0x14d   : > { %1231 = vrot.lane.b32.xlu0 %v3223_v37, %s2748_s13  ;;  %v776_v41 = vmul.f32 %v3133_v38, %v752_v22  ;;  %v2310_v22 = vld [vmem:[%s3803_s1 + $0x68] sm:$0xff]  ;;  %v1131_v36 = vshll.u32 %v3342_v28, 16  ;;  %v1187_v44 = vrot.slane %v3342_v28, 1  ;;  %v1129_v47 = vshrl.u32 %v3342_v28, 16 }
 0x14e   : > { %1629 = vmatpush.bf16.msrb.mxu1 %v2310_v22  ;;  %v2297_v22 = vld [vmem:[%s3803_s1] sm:$0xff] }
 0x14f   : > { %v795_v49 = vadd.f32 %v3138_v39, %v776_v41  ;;  %v860_v41 = vpop.f32.mrf.mxu2  ;;  %v1133_v51 = vrot.slane %v1131_v36, 1 }
 0x151   : > { %v811_v58 = vmax.f32 %v795_v49, 0.0  ;;  %v1134_v61 = vor.u32 %v1133_v51, %v1129_v47 }
 0x152   : > { %1630 = vmatpush.bf16.msrb.mxu1 %v2309_v30 }
 0x153   : > { %v887_v0 = vpack.c.bf16 %v811_v58, %v811_v58  ;;  %v1189_v58 = vsel %vm1168_vm3, %v1187_v44, %v1188_v46 }
 0x154   : > { %1263 = vrot.lane.b32.xlu2 %v3238_v57, %s2747_s14  ;;  %1295 = vrot.lane.b32.xlu1 %v3262_v11, %s2749_s8  ;;  %v755_v50 = vpop.f32.mrf.mxu3 }
 0x155   : > { %1279 = vrot.lane.b32.xlu0 %v1180_v63, %s2748_s13  ;;  %v927_v14 = vunpack.c.l.b16 %v887_v0  ;;  %v777_v17 = vmul.f32 %v3133_v38, %v755_v50 }
 0x156   : > { %1631 = vmatpush.bf16.msrb.mxu1 %v2308_v42 }
 0x157   : > { %2253 = vmatmul.msk.bf16.gmra.mxu2 %vm1323_vm5, %v1183_v34  ;;  %v939_v24 = vpack.c.b16 %v927_v14, %v926_v7  ;;  %v796_v27 = vadd.f32 %v3138_v39, %v777_v17 }
 0x159   : > { %v992_v33 = vshrl.u32 %v939_v24, 16  ;;  %v995_v43 = vshll.u32 %v939_v24, 16 }
 0x15a   : > { %1632 = vmatpush.bf16.msrb.mxu1 %v2307_v59 }
 0x15b   : > { %v994_v49 = vrot.slane %v992_v33, 7 }
 0x15c   : > { %1311 = vrot.lane.b32.xlu2 %v3286_v48, %s2747_s14  ;;  %1249 = vrot.lane.b32.xlu1 %v1180_v63, %s2749_s8  ;;  %v1185_v63 = vrot.slane %v1050_v56, 1  ;;  %v757_v6 = vpop.f32.mrf.mxu3  ;;  %v864_v56 = vmul.f32 %v3133_v38, %v860_v41 }
 0x15d   : > { %1233 = vrot.lane.b32.xlu0 %v3254_v12, %s2748_s13  ;;  %v778_v20 = vmul.f32 %v3133_v38, %v757_v6  ;;  %v997_v60 = vor.u32 %v995_v43, %v994_v49  ;;  %v2299_v38 = vld [vmem:[%s3803_s1 + $0x10] sm:$0xff]  ;;  %v867_v6 = vmax.f32 %v865_v1, 0.0  ;;  %v1052_v14 = vsel %vm3157_vm2, %v994_v49, 0 }
 0x15e   : > { %v3315_v8 = vsel %vm1168_vm3, %v1184_v62, %v1185_v63  ;;  %v1138_v62 = vrot.slane %v1136_v53, 1  ;;  %v866_v2 = vadd.f32 %v3138_v39, %v864_v56  ;;  %1583 = vmatpush.bf16.msrb.mxu3 %v2299_v38  ;;  %1633 = vmatpush.bf16.msrb.mxu1 %v2306_v3 }
 0x15f   : > { %v797_v29 = vadd.f32 %v3138_v39, %v778_v20  ;;  %v3394_v39 = vsel %vm3157_vm2, 0, %v997_v60  ;;  %v870_v17 = vmul.f32 %v869_v9, %v867_v6  ;;  %v1191_v20 = vrot.slane %v1052_v14, 1 }
 0x160   : > { %v3386_v4 = vsel %vm1055_vm4, %v1134_v61, %v1138_v62  ;;  %v868_v7 = vmax.f32 %v866_v2, 0.0  ;;  %v1190_v19 = vrot.slane %v3394_v39, 1  ;;  %v1141_v23 = vshrl.u32 %v3394_v39, 16 }
 0x161   : > { %v813_v40 = vmax.f32 %v797_v29, 0.0  ;;  %v890_v31 = vpack.c.bf16 %v870_v17, %v870_v17 }
 0x162   : > { %v871_v18 = vmul.f32 %v869_v9, %v868_v7  ;;  %1584 = vmatpush.bf16.msrb.mxu3 %v2298_v13  ;;  %1634 = vmatpush.bf16.msrb.mxu1 %v2305_v15 }
 0x163   : > { %v889_v54 = vpack.c.bf16 %v813_v40, %v813_v40  ;;  %v930_v40 = vunpack.c.l.b16 %v890_v31 }
 0x164   : > { %1265 = vrot.lane.b32.xlu2 %v3262_v11, %s2747_s14  ;;  %1297 = vrot.lane.b32.xlu1 %v3294_v52, %s2749_s8  ;;  %v891_v33 = vpack.c.bf16 %v871_v18, %v871_v18 }
 0x165   : > { %1281 = vrot.lane.b32.xlu0 %v1183_v34, %s2748_s13  ;;  %v929_v0 = vunpack.c.l.b16 %v889_v54 }
 0x166   : > { %1585 = vmatpush.bf16.msrb.mxu3 %v2297_v22  ;;  %v931_v41 = vunpack.c.l.b16 %v891_v33 }
 0x167   : > { %2254 = vmatmul.msk.bf16.gmra.mxu2 %vm1323_vm5, %v3315_v8 }
 0x168   : > { %v941_v44 = vpack.c.b16 %v931_v41, %v930_v40 }
 0x16a   : > { %v1006_v51 = vshrl.u32 %v941_v44, 16  ;;  %v1009_v60 = vshll.u32 %v941_v44, 16 }
 0x16c   : > { %1313 = vrot.lane.b32.xlu2 %v3334_v25, %s2747_s14  ;;  %1251 = vrot.lane.b32.xlu1 %v1183_v34, %s2749_s8  ;;  %v812_v34 = vmax.f32 %v796_v27, 0.0  ;;  %v1148_v27 = vshll.u32 %v1052_v14, 16 }
 0x16d   : > { %1235 = vrot.lane.b32.xlu0 %v3286_v48, %s2748_s13 }
 0x16e   : > { %v888_v50 = vpack.c.bf16 %v812_v34, %v812_v34  ;;  %v1192_v34 = vsel %vm1168_vm3, %v1190_v19, %v1191_v20  ;;  %v1150_v36 = vrot.slane %v1148_v27, 1 }
 0x170   : > { %v928_v63 = vunpack.c.l.b16 %v888_v50 }
 0x172   : > { %v940_v5 = vpack.c.b16 %v929_v0, %v928_v63 }
 0x174   : > { %1267 = vrot.lane.b32.xlu2 %v3294_v52, %s2747_s14  ;;  %1299 = vrot.lane.b32.xlu1 %v3342_v28, %s2749_s8  ;;  %v999_v16 = vshrl.u32 %v940_v5, 16  ;;  %v1002_v30 = vshll.u32 %v940_v5, 16 }
 0x175   : > { %1283 = vrot.lane.b32.xlu0 %v3315_v8, %s2748_s13 }
 0x176   : > { %v1001_v29 = vrot.slane %v999_v16, 7 }
 0x177   : > { %2255 = vmatmul.msk.bf16.gmra.mxu2 %vm1323_vm5, %v1189_v58 }
 0x178   : > { %v1004_v42 = vor.u32 %v1002_v30, %v1001_v29  ;;  %v1053_v49 = vsel %vm3157_vm2, %v1001_v29, 0 }
 0x179   : > { %v1208_v54 = vrot.slane %v1053_v49, 1  ;;  %v1201_v59 = vshll.u32 %v1053_v49, 16 }
 0x17a   : > { %v1043_v46 = vsel %vm3157_vm2, 0, %v1004_v42 }
 0x17b   : > { %v1196_v50 = vshll.u32 %v1043_v46, 16  ;;  %v1207_v53 = vrot.slane %v1043_v46, 1  ;;  %v1194_v55 = vshrl.u32 %v1043_v46, 16  ;;  %v1203_v0 = vrot.slane %v1201_v59, 1 }
 0x17c   : > { %1315 = vrot.lane.b32.xlu2 %v3386_v4, %s2747_s14  ;;  %1253 = vrot.lane.b32.xlu1 %v3315_v8, %s2749_s8  ;;  %v1143_v8 = vshll.u32 %v3394_v39, 16 }
 0x17d   : > { %1237 = vrot.lane.b32.xlu0 %v3334_v25, %s2748_s13  ;;  %v1198_v56 = vrot.slane %v1196_v50, 1  ;;  %v1209_v38 = vsel %vm1168_vm3, %v1207_v53, %v1208_v54 }
 0x17e   : > { %v1145_v24 = vrot.slane %v1143_v8, 1 }
 0x17f   : > { %v1199_v63 = vor.u32 %v1198_v56, %v1194_v55 }
 0x180   : > { %v1146_v35 = vor.u32 %v1145_v24, %v1141_v23 }
 0x181   : > { %v3438_v2 = vsel %vm1055_vm4, %v1199_v63, %v1203_v0 }
 0x182   : > { %v3420_v43 = vsel %vm1055_vm4, %v1146_v35, %v1150_v36 }
 0x184   : > { %1269 = vrot.lane.b32.xlu2 %v3342_v28, %s2747_s14  ;;  %1301 = vrot.lane.b32.xlu1 %v3394_v39, %s2749_s8 }
 0x185   : > { %1285 = vrot.lane.b32.xlu0 %v1189_v58, %s2748_s13 }
 0x187   : > { %2256 = vmatmul.msk.bf16.gmra.mxu2 %vm1323_vm5, %v1192_v34 }
 0x18c   : > { %1317 = vrot.lane.b32.xlu2 %v3420_v43, %s2747_s14  ;;  %1255 = vrot.lane.b32.xlu1 %v1189_v58, %s2749_s8  ;;  %v1008_v58 = vrot.slane %v1006_v51, 7 }
 0x18d   : > { %1239 = vrot.lane.b32.xlu0 %v3386_v4, %s2748_s13 }
 0x18e   : > { %v1292_v47 = vpop.permute.xlu2 %1291  ;;  %v1011_v1 = vor.u32 %v1009_v60, %v1008_v58  ;;  %v1054_v13 = vsel %vm3157_vm2, %v1008_v58, 0 }
 0x18f   : > { %v1225_v17 = vrot.slane %v1054_v13, 1  ;;  %v1218_v20 = vshll.u32 %v1054_v13, 16 }
 0x190   : > { %v1044_v3 = vsel %vm3157_vm2, 0, %v1011_v1 }
 0x191   : > { %v1213_v9 = vshll.u32 %v1044_v3, 16  ;;  %v1224_v16 = vrot.slane %v1044_v3, 1  ;;  %v1211_v18 = vshrl.u32 %v1044_v3, 16  ;;  %v1220_v23 = vrot.slane %v1218_v20, 1 }
 0x193   : > { %v1215_v19 = vrot.slane %v1213_v9, 1  ;;  %v1226_v21 = vsel %vm1168_vm3, %v1224_v16, %v1225_v17 }
 0x194   : > { %1271 = vrot.lane.b32.xlu2 %v3394_v39, %s2747_s14  ;;  %1303 = vrot.lane.b32.xlu1 %v1043_v46, %s2749_s8 }
 0x195   : > { %1287 = vrot.lane.b32.xlu0 %v1192_v34, %s2748_s13  ;;  %v1216_v22 = vor.u32 %v1215_v19, %v1211_v18 }
 0x196   : > { %v1308_v61 = vpop.permute.xlu2 %1307  ;;  %v1260_v62 = vpop.permute.xlu1 %1259 }
 0x197   : > { %2257 = vmatmul.msk.bf16.gmra.mxu2 %vm1323_vm5, %v1209_v38  ;;  %v1221_v31 = vsel %vm1055_vm4, %v1216_v22, %v1220_v23 }
 0x19c   : > { %1319 = vrot.lane.b32.xlu2 %v3438_v2, %s2747_s14  ;;  %1257 = vrot.lane.b32.xlu1 %v1192_v34, %s2749_s8 }
 0x19d   : > { %1241 = vrot.lane.b32.xlu0 %v3420_v43, %s2748_s13 }
 0x19e   : > { %v1262_v5 = vpop.permute.xlu2 %1261  ;;  %v1276_v6 = vpop.permute.xlu1 %1275 }
 0x19f   : > { %v1384_v7 = vsel %vm1323_vm5, %v3230_v45, %v1276_v6  ;;  %v1228_v14 = vpop.permute.xlu0 %1227 }
 0x1a0   : > { %v1407_v8 = vsel %vm1340_vm6, %v1384_v7, %v1292_v47  ;;  %v1325_v24 = vsel %vm1323_vm5, %v3180_v32, %v1228_v14 }
 0x1a1   : > { %v1423_v15 = vsel %vm1357_vm7, %v1407_v8, %v1308_v61 }
 0x1a2   : > { %1635 = vmatmul.bf16.vlgmr.msrb.gmra.mxu1 %v1423_v15 }
 0x1a4   : > { %1273 = vrot.lane.b32.xlu2 %v1043_v46, %s2747_s14  ;;  %1305 = vrot.lane.b32.xlu1 %v1044_v3, %s2749_s8  ;;  %s3806_s8 = sld [smem:[#allocation34_spill]] }
 0x1a5   : > { %1289 = vrot.lane.b32.xlu0 %v1209_v38, %s2748_s13  ;;  %s2317_s13 = sshll.u32 %s3800_s4, 4  ;;  %s3812_s4 = sld [smem:[#allocation37_spill]] }
 0x1a6   : > { %v1310_v45 = vpop.permute.xlu2 %1309  ;;  %v1246_v33 = vpop.permute.xlu1 %1245 }
 0x1a7   : > { %2258 = vmatmul.msk.bf16.gmra.mxu2 %vm1323_vm5, %v1226_v21  ;;  %v1244_v27 = vpop.permute.xlu0 %1243 }
 0x1a8   : > { %v1342_v29 = vsel %vm1340_vm6, %v1325_v24, %v1244_v27 }
 0x1a9   : > { %v1359_v30 = vsel %vm1357_vm7, %v1342_v29, %v1260_v62 }
 0x1aa   : > { %1586 = vmatmul.bf16.vlgmr.msrb.gmra.mxu3 %v1359_v30 }
 0x1ac   : > { %1321 = vrot.lane.b32.xlu2 %v1221_v31, %s2747_s14  ;;  %s3591_s14 = scalar_lea.vmem [#allocation8], %s2143_s12  ;;  %s3811_s12 = sld [smem:[#allocation17_spill]] }
 0x1ad   : > { %s1974_s0 = sshll.u32 %s3591_s14, 4  ;;  %s1975_s0 = int_to_ptr.vmem [resolvable:$true] %s1974_s0 }
 0x1ae   : > { %v1264_v34 = vpop.permute.xlu2 %1263 }
 0x1af   : > { %v1230_v35 = vpop.permute.xlu0 %1229 }
 0x1b0   : > { %v1327_v36 = vsel %vm1323_vm5, %v3165_v26, %v1230_v35 }
 0x1b1   : > { %v1344_v32 = vsel %vm1340_vm6, %v1327_v36, %v1246_v33 }
 0x1b2   : > { %v1362_v46 = vsel %vm1357_vm7, %v1344_v32, %v1262_v5  ;;  %s2278_s15 = sshll.u32 %s3811_s12, 5 }
 0x1b3   : > { %s1971_s9 = sadd.s32 %s2317_s13, %s2278_s15 }
 0x1b4   : > { %s2279_s6 = sshll.u32 %s1971_s9, 3 }
 0x1b5   : > { %s1973_s3 = scalar_lea.hbm %s3812_s4, %s2279_s6 }
 0x1b6   : > { %v1312_v40 = vpop.permute.xlu2 %1311  ;;  %v1294_v41 = vpop.permute.xlu1 %1293 }
 0x1b7   : > { %v1278_v42 = vpop.permute.xlu0 %1277 }
 0x1b8   : > { %v1387_v44 = vsel %vm1323_vm5, %v3223_v37, %v1278_v42 }
 0x1b9   : > { %v1409_v47 = vsel %vm1340_vm6, %v1387_v44, %v1294_v41 }
 0x1ba   : > { %1591 = vmatmul.bf16.gmra.mxu3 %v1362_v46  ;;  %v1426_v49 = vsel %vm1357_vm7, %v1409_v47, %v1310_v45  ;;  %v2315_v47 = vld [vmem:[%s3806_s8] sm:$0xff] }
 0x1bb   : > { %1640 = vmatmul.bf16.gmra.mxu1 %v1426_v49 }
 0x1be   : > { %v1248_v50 = vpop.permute.xlu1 %1247  ;;  %v1266_v51 = vpop.permute.xlu2 %1265 }
 0x1bf   : > { %v1232_v53 = vpop.permute.xlu0 %1231 }
 0x1c0   : > { %v1329_v26 = vsel %vm1323_vm5, %v3205_v10, %v1232_v53  ;;  %v1685_v53 = vpop.f32.mrf.mxu2 }
 0x1c1   : > { %v1346_v55 = vsel %vm1340_vm6, %v1329_v26, %v1248_v50 }
 0x1c2   : > { %v1365_v58 = vsel %vm1357_vm7, %v1346_v55, %v1264_v34 }
 0x1c6   : > { %v1296_v54 = vpop.permute.xlu1 %1295  ;;  %v1314_v59 = vpop.permute.xlu2 %1313 }
 0x1c7   : > { %v1280_v56 = vpop.permute.xlu0 %1279 }
 0x1c8   : > { %v1390_v37 = vsel %vm1323_vm5, %v3254_v12, %v1280_v56 }
 0x1c9   : > { %v1411_v60 = vsel %vm1340_vm6, %v1390_v37, %v1296_v54 }
 0x1ca   : > { %1596 = vmatmul.bf16.gmra.mxu3 %v1365_v58  ;;  %v1429_v61 = vsel %vm1357_vm7, %v1411_v60, %v1312_v40 }
 0x1cb   : > { %1645 = vmatmul.bf16.gmra.mxu1 %v1429_v61  ;;  %v1687_v61 = vpop.f32.mrf.mxu2 }
 0x1ce   : > { %v1250_v62 = vpop.permute.xlu1 %1249  ;;  %v1268_v63 = vpop.permute.xlu2 %1267 }
 0x1cf   : > { %v1234_v38 = vpop.permute.xlu0 %1233 }
 0x1d0   : > { %v1331_v10 = vsel %vm1323_vm5, %v3238_v57, %v1234_v38 }
 0x1d1   : > { %v1348_v1 = vsel %vm1340_vm6, %v1331_v10, %v1250_v62 }
 0x1d2   : > { %v1368_v5 = vsel %vm1357_vm7, %v1348_v1, %v1266_v51 }
 0x1d3   : > { %v1690_v62 = vpop.f32.mrf.mxu2 }
 0x1d6   : > { %v1298_v0 = vpop.permute.xlu1 %1297  ;;  %v1316_v9 = vpop.permute.xlu2 %1315 }
 0x1d7   : > { %v1282_v3 = vpop.permute.xlu0 %1281 }
 0x1d8   : > { %v1393_v12 = vsel %vm1323_vm5, %v3286_v48, %v1282_v3 }
 0x1d9   : > { %v1413_v6 = vsel %vm1340_vm6, %v1393_v12, %v1298_v0 }
 0x1da   : > { %1601 = vmatmul.bf16.gmra.mxu3 %v1368_v5  ;;  %v1432_v7 = vsel %vm1357_vm7, %v1413_v6, %v1314_v59  ;;  %v3535_v5 = vld [vmem:[%s3808_s27] ss:$0 sm:$0xff]  ;;  %s1976_s27 = sshll.u32 %s1973_s3, 4  ;;  %s1977_s27 = int_to_ptr.hbm [resolvable:$true] %s1976_s27 }
 0x1db   : > { %1650 = vmatmul.bf16.gmra.mxu1 %v1432_v7  ;;  %v1692_v10 = vpop.f32.mrf.mxu2  ;;  %s2603_s18 = sshra.s32 %s1977_s27, 4  ;;  %s2604_s18 = int_to_ptr.hbm [resolvable:$true] %s2603_s18 }
 0x1dc   : > { %p2610_p8 = scmp.lt.s32.totalorder %s2604_s18, %s3812_s4 }
 0x1de   : > { %v1252_v13 = vpop.permute.xlu1 %1251  ;;  %v1270_v16 = vpop.permute.xlu2 %1269 }
 0x1df   : > { %v1236_v14 = vpop.permute.xlu0 %1235 }
 0x1e0   : > { %v1333_v57 = vsel %vm1323_vm5, %v3262_v11, %v1236_v14  ;;  %v2316_v11 = vld [vmem:[%s3806_s8 + $0x8] sm:$0xff] }
 0x1e1   : > { %v1350_v15 = vsel %vm1340_vm6, %v1333_v57, %v1252_v13  ;;  %1829 = vmatpush.bf16.msrb.mxu0 %v2316_v11 }
 0x1e2   : > { %v1371_v18 = vsel %vm1357_vm7, %v1350_v15, %v1268_v63 }
 0x1e3   : > { %v1695_v13 = vpop.f32.mrf.mxu2 }
 0x1e5   : > { %1830 = vmatpush.bf16.msrb.mxu0 %v2315_v47 }
 0x1e6   : > { %v1300_v8 = vpop.permute.xlu1 %1299  ;;  %v1318_v22 = vpop.permute.xlu2 %1317 }
 0x1e7   : > { %v1284_v17 = vpop.permute.xlu0 %1283 }
 0x1e8   : > { %v1396_v48 = vsel %vm1323_vm5, %v3334_v25, %v1284_v17 }
 0x1e9   : > { %v1415_v19 = vsel %vm1340_vm6, %v1396_v48, %v1300_v8 }
 0x1ea   : > { %1606 = vmatmul.bf16.gmra.mxu3 %v1371_v18  ;;  %v1435_v20 = vsel %vm1357_vm7, %v1415_v19, %v1316_v9 }
 0x1eb   : > { %1655 = vmatmul.bf16.gmra.mxu1 %v1435_v20 }
 0x1ee   : > { %v1254_v45 = vpop.permute.xlu1 %1253  ;;  %v1272_v34 = vpop.permute.xlu2 %1271 }
 0x1ef   : > { %v1238_v21 = vpop.permute.xlu0 %1237 }
 0x1f0   : > { %v1335_v23 = vsel %vm1323_vm5, %v3294_v52, %v1238_v21 }
 0x1f1   : > { %v1352_v24 = vsel %vm1340_vm6, %v1335_v23, %v1254_v45  ;;  %v1697_v45 = vpop.f32.mrf.mxu2 }
 0x1f2   : > { %v1374_v30 = vsel %vm1357_vm7, %v1352_v24, %v1270_v16 }
 0x1f6   : > { %v1302_v25 = vpop.permute.xlu1 %1301  ;;  %v1320_v40 = vpop.permute.xlu2 %1319 }
 0x1f7   : > { %v1286_v27 = vpop.permute.xlu0 %1285 }
 0x1f8   : > { %v1399_v29 = vsel %vm1323_vm5, %v3386_v4, %v1286_v27 }
 0x1f9   : > { %v1417_v31 = vsel %vm1340_vm6, %v1399_v29, %v1302_v25 }
 0x1fa   : > { %1611 = vmatmul.bf16.gmra.mxu3 %v1374_v30  ;;  %v1438_v33 = vsel %vm1357_vm7, %v1417_v31, %v1318_v22  ;;  %v1700_v30 = vpop.f32.mrf.mxu2 }
 0x1fb   : > { %1660 = vmatmul.bf16.gmra.mxu1 %v1438_v33 }
 0x1fe   : > { %v1256_v35 = vpop.permute.xlu1 %1255  ;;  %v1274_v50 = vpop.permute.xlu2 %1273 }
 0x1ff   : > { %v1240_v36 = vpop.permute.xlu0 %1239 }
 0x200   : > { %v1337_v52 = vsel %vm1323_vm5, %v3342_v28, %v1240_v36 }
 0x201   : > { %v1354_v32 = vsel %vm1340_vm6, %v1337_v52, %v1256_v35 }
 0x202   : > { %v1377_v44 = vsel %vm1357_vm7, %v1354_v32, %v1272_v34 }
 0x206   : > { %v1304_v41 = vpop.permute.xlu1 %1303  ;;  %v1322_v37 = vpop.permute.xlu2 %1321 }
 0x207   : > { %v1288_v42 = vpop.permute.xlu0 %1287 }
 0x208   : > { %v1402_v4 = vsel %vm1323_vm5, %v3420_v43, %v1288_v42 }
 0x209   : > { %v1419_v46 = vsel %vm1340_vm6, %v1402_v4, %v1304_v41  ;;  %v1702_v4 = vpop.f32.mrf.mxu2 }
 0x20a   : > { %1616 = vmatmul.bf16.gmra.mxu3 %v1377_v44  ;;  %v1441_v49 = vsel %vm1357_vm7, %v1419_v46, %v1320_v40 }
 0x20b   : > { %1665 = vmatmul.bf16.gmra.mxu1 %v1441_v49 }
 0x20e   : > { %v1258_v28 = vpop.permute.xlu1 %1257 }
 0x20f   : > { %v1242_v51 = vpop.permute.xlu0 %1241 }
 0x210   : > { %v1339_v43 = vsel %vm1323_vm5, %v3394_v39, %v1242_v51 }
 0x211   : > { %v1356_v26 = vsel %vm1340_vm6, %v1339_v43, %v1258_v28 }
 0x212   : > { %v1380_v59 = vsel %vm1357_vm7, %v1356_v26, %v1274_v50 }
 0x216   : > { %v1306_v55 = vpop.permute.xlu1 %1305 }
 0x217   : > { %v1290_v54 = vpop.permute.xlu0 %1289 }
 0x218   : > { %v1405_v56 = vsel %vm1323_vm5, %v3438_v2, %v1290_v54  ;;  %v3529_v2 = vld [vmem:[%s3807_s29] ss:$0 sm:$0xff] }
 0x219   : > { %v1421_v58 = vsel %vm1340_vm6, %v1405_v56, %v1306_v55  ;;  %v1705_v55 = vpop.f32.mrf.mxu2 }
 0x21a   : > { %1621 = vmatmul.bf16.gmra.mxu3 %v1380_v59  ;;  %v1444_v60 = vsel %vm1357_vm7, %v1421_v58, %v1322_v37 }
 0x21b   : > { %1670 = vmatmul.bf16.gmra.mxu1 %v1444_v60 }
 0x21f   : > { %v1636_v38 = vpop.f32.mrf.mxu1 }
 0x227   : > { %v1638_v0 = vpop.f32.mrf.mxu1 }
 0x22d   : > { %v1587_v39 = vpop.f32.mrf.mxu3 }
 0x22e   : > { %v1637_v63 = vadd.f32 %v1636_v38, %v1587_v39  ;;  %v1707_v39 = vpop.f32.mrf.mxu2 }
 0x230   : > { %v1686_v1 = vadd.f32 %v1685_v53, %v1637_v63 }
 0x232   : > { %v1728_v12 = vmul.f32 %v3529_v2, %v1686_v1 }
 0x234   : > { %v1747_v14 = vadd.f32 %v3535_v5, %v1728_v12 }
 0x235   : > { %v1589_v3 = vpop.f32.mrf.mxu3 }
 0x236   : > { %v1639_v6 = vadd.f32 %v1638_v0, %v1589_v3  ;;  %v1763_v16 = vmax.f32 %v1747_v14, 0.0 }
 0x238   : > { %v1688_v7 = vadd.f32 %v1687_v61, %v1639_v6  ;;  %v1641_v9 = vpop.f32.mrf.mxu1 }
 0x23a   : > { %v1729_v57 = vmul.f32 %v3529_v2, %v1688_v7 }
 0x23c   : > { %v1748_v8 = vadd.f32 %v3535_v5, %v1729_v57 }
 0x23d   : > { %v1592_v15 = vpop.f32.mrf.mxu3 }
 0x23e   : > { %v1764_v17 = vmax.f32 %v1748_v8, 0.0  ;;  %v1642_v48 = vadd.f32 %v1641_v9, %v1592_v15  ;;  %v1710_v9 = vpop.f32.mrf.mxu2 }
 0x240   : > { %v1643_v18 = vpop.f32.mrf.mxu1  ;;  %v1779_v19 = vpack.c.bf16 %v1764_v17, %v1763_v16  ;;  %v1691_v20 = vadd.f32 %v1690_v62, %v1642_v48 }
 0x242   : > { %2267 = vmatmul.msk.bf16.vlgmr.msrb.gmra.mxu0 %vm1323_vm5, %v1779_v19  ;;  %v1730_v22 = vmul.f32 %v3529_v2, %v1691_v20 }
 0x244   : > { %v1749_v27 = vadd.f32 %v3535_v5, %v1730_v22 }
 0x245   : > { %v1594_v21 = vpop.f32.mrf.mxu3 }
 0x246   : > { %v1644_v11 = vadd.f32 %v1643_v18, %v1594_v21  ;;  %v1765_v34 = vmax.f32 %v1749_v27, 0.0  ;;  %v1712_v21 = vpop.f32.mrf.mxu2 }
 0x248   : > { %v1693_v23 = vadd.f32 %v1692_v10, %v1644_v11  ;;  %v1646_v25 = vpop.f32.mrf.mxu1 }
 0x24a   : > { %v1731_v24 = vmul.f32 %v3529_v2, %v1693_v23 }
 0x24c   : > { %v1750_v29 = vadd.f32 %v3535_v5, %v1731_v24 }
 0x24d   : > { %v1597_v31 = vpop.f32.mrf.mxu3 }
 0x24e   : > { %v1647_v33 = vadd.f32 %v1646_v25, %v1597_v31  ;;  %v1766_v35 = vmax.f32 %v1750_v29, 0.0  ;;  %v1715_v31 = vpop.f32.mrf.mxu2 }
 0x250   : > { %v1648_v36 = vpop.f32.mrf.mxu1  ;;  %v1780_v52 = vpack.c.bf16 %v1766_v35, %v1765_v34  ;;  %v1696_v40 = vadd.f32 %v1695_v13, %v1647_v33 }
 0x252   : > { %2268 = vmatmul.msk.bf16.gmra.mxu0 %vm1323_vm5, %v1780_v52  ;;  %v1732_v32 = vmul.f32 %v3529_v2, %v1696_v40 }
 0x254   : > { %v1751_v49 = vadd.f32 %v3535_v5, %v1732_v32 }
 0x255   : > { %v1599_v41 = vpop.f32.mrf.mxu3 }
 0x256   : > { %v1649_v42 = vadd.f32 %v1648_v36, %v1599_v41  ;;  %v1767_v53 = vmax.f32 %v1751_v49, 0.0 }
 0x258   : > { %v1698_v44 = vadd.f32 %v1697_v45, %v1649_v42  ;;  %v1651_v46 = vpop.f32.mrf.mxu1 }
 0x25a   : > { %v1733_v47 = vmul.f32 %v3529_v2, %v1698_v44  ;;  %v1717_v44 = vpop.f32.mrf.mxu2 }
 0x25c   : > { %v1752_v28 = vadd.f32 %v3535_v5, %v1733_v47 }
 0x25d   : > { %v1602_v50 = vpop.f32.mrf.mxu3 }
 0x25e   : > { %v1652_v51 = vadd.f32 %v1651_v46, %v1602_v50  ;;  %v1768_v43 = vmax.f32 %v1752_v28, 0.0 }
 0x260   : > { %v1653_v26 = vpop.f32.mrf.mxu1  ;;  %v1781_v54 = vpack.c.bf16 %v1768_v43, %v1767_v53  ;;  %v1701_v56 = vadd.f32 %v1700_v30, %v1652_v51 }
 0x262   : > { %2269 = vmatmul.msk.bf16.gmra.mxu0 %vm1323_vm5, %v1781_v54  ;;  %v1734_v59 = vmul.f32 %v3529_v2, %v1701_v56 }
 0x264   : > { %v1753_v38 = vadd.f32 %v3535_v5, %v1734_v59 }
 0x265   : > { %v1604_v37 = vpop.f32.mrf.mxu3 }
 0x266   : > { %v1654_v58 = vadd.f32 %v1653_v26, %v1604_v37  ;;  %v1769_v1 = vmax.f32 %v1753_v38, 0.0  ;;  %v1720_v26 = vpop.f32.mrf.mxu2 }
 0x268   : > { %v1703_v60 = vadd.f32 %v1702_v4, %v1654_v58  ;;  %v1656_v61 = vpop.f32.mrf.mxu1 }
 0x26a   : > { %v1735_v62 = vmul.f32 %v3529_v2, %v1703_v60 }
 0x26c   : > { %v1754_v63 = vadd.f32 %v3535_v5, %v1735_v62 }
 0x26d   : > { %v1607_v10 = vpop.f32.mrf.mxu3 }
 0x26e   : > { %v1657_v0 = vadd.f32 %v1656_v61, %v1607_v10  ;;  %v1770_v3 = vmax.f32 %v1754_v63, 0.0 }
 0x270   : > { %v1658_v12 = vpop.f32.mrf.mxu1  ;;  %v1782_v6 = vpack.c.bf16 %v1770_v3, %v1769_v1  ;;  %v1706_v7 = vadd.f32 %v1705_v55, %v1657_v0 }
 0x272   : > { %2270 = vmatmul.msk.bf16.gmra.mxu0 %vm1323_vm5, %v1782_v6  ;;  %v1736_v14 = vmul.f32 %v3529_v2, %v1706_v7  ;;  %v3579_v7 = vld [vmem:[%s3809_s26] ss:$0 sm:$0xff]  ;;  %s2605_s26 = scalar_lea.hbm %s2604_s18, 128 }
 0x273   : > { %p2606_p7 = scmp.ne.s32.totalorder %s2604_s18, %s2605_s26 }
 0x274   : > { %v1755_v17 = vadd.f32 %v3535_v5, %v1736_v14  ;;  %v2483_v14 = vld [vmem:[%s3058_s20] sm:$0xff] }
 0x275   : > { %v1609_v13 = vpop.f32.mrf.mxu3  ;;  %p2607_p3 = pnand %p2606_p7, %p2988_p4 }
 0x276   : > { %v1659_v57 = vadd.f32 %v1658_v12, %v1609_v13  ;;  %v1771_v20 = vmax.f32 %v1755_v17, 0.0 }
 0x277   : > { %p2608_p5 = pneg %p2607_p3 }
 0x278   : > { %v1708_v8 = vadd.f32 %v1707_v39, %v1659_v57  ;;  %v1661_v15 = vpop.f32.mrf.mxu1  ;;  %v1722_v39 = vpop.f32.mrf.mxu2 }
 0x27a   : > { %v1737_v16 = vmul.f32 %v3529_v2, %v1708_v8 }
 0x27c   : > { %v1756_v48 = vadd.f32 %v3535_v5, %v1737_v16 }
 0x27d   : > { %v1612_v18 = vpop.f32.mrf.mxu3 }
 0x27e   : > { %v1662_v19 = vadd.f32 %v1661_v15, %v1612_v18  ;;  %v1772_v45 = vmax.f32 %v1756_v48, 0.0  ;;  %v2484_v48 = vld [vmem:[%s3058_s20 + $0x8] sm:$0xff] }
 0x280   : > { %v1663_v22 = vpop.f32.mrf.mxu1  ;;  %v1783_v11 = vpack.c.bf16 %v1772_v45, %v1771_v20  ;;  %v1711_v23 = vadd.f32 %v1710_v9, %v1662_v19 }
 0x282   : > { %2271 = vmatmul.msk.bf16.gmra.mxu0 %vm1323_vm5, %v1783_v11  ;;  %v1738_v24 = vmul.f32 %v3529_v2, %v1711_v23 }
 0x284   : > { %v1757_v34 = vadd.f32 %v3535_v5, %v1738_v24 }
 0x285   : > { %v1614_v25 = vpop.f32.mrf.mxu3 }
 0x286   : > { %v1664_v27 = vadd.f32 %v1663_v22, %v1614_v25  ;;  %v1773_v40 = vmax.f32 %v1757_v34, 0.0  ;;  %v2485_v22 = vld [vmem:[%s3058_s20 + $0x10] sm:$0xff] }
 0x288   : > { %v1713_v29 = vadd.f32 %v1712_v21, %v1664_v27  ;;  %v1666_v30 = vpop.f32.mrf.mxu1 }
 0x28a   : > { %v1739_v33 = vmul.f32 %v3529_v2, %v1713_v29  ;;  %v2486_v29 = vld [vmem:[%s3058_s20 + $0x18] sm:$0xff] }
 0x28c   : > { %v1758_v35 = vadd.f32 %v3535_v5, %v1739_v33 }
 0x28d   : > { %v1617_v36 = vpop.f32.mrf.mxu3 }
 0x28e   : > { %v1667_v52 = vadd.f32 %v1666_v30, %v1617_v36  ;;  %v1774_v41 = vmax.f32 %v1758_v35, 0.0  ;;  %v2487_v36 = vld [vmem:[%s3058_s20 + $0x20] sm:$0xff] }
 0x290   : > { %v1784_v32 = vpack.c.bf16 %v1774_v41, %v1773_v40  ;;  %v1668_v42 = vpop.f32.mrf.mxu1  ;;  %v1716_v4 = vadd.f32 %v1715_v31, %v1667_v52 }
 0x292   : > { %2272 = vmatmul.msk.bf16.gmra.mxu0 %vm1323_vm5, %v1784_v32  ;;  %v1740_v47 = vmul.f32 %v3529_v2, %v1716_v4  ;;  %v2488_v4 = vld [vmem:[%s3058_s20 + $0x28] sm:$0xff] }
 0x294   : > { %v1759_v51 = vadd.f32 %v3535_v5, %v1740_v47 }
 0x295   : > { %v1619_v46 = vpop.f32.mrf.mxu3 }
 0x296   : > { %v1669_v49 = vadd.f32 %v1668_v42, %v1619_v46  ;;  %v1775_v56 = vmax.f32 %v1759_v51, 0.0 }
 0x298   : > { %v1718_v28 = vadd.f32 %v1717_v44, %v1669_v49  ;;  %v1671_v53 = vpop.f32.mrf.mxu1 }
 0x29a   : > { %v1741_v50 = vmul.f32 %v3529_v2, %v1718_v28 }
 0x29c   : > { %v1760_v43 = vadd.f32 %v3535_v5, %v1741_v50  ;;  %v2489_v50 = vld [vmem:[%s3058_s20 + $0x30] sm:$0xff] }
 0x29d   : > { %v1622_v54 = vpop.f32.mrf.mxu3 }
 0x29e   : > { %v1672_v55 = vadd.f32 %v1671_v53, %v1622_v54  ;;  %v1776_v37 = vmax.f32 %v1760_v43, 0.0 }
 0x2a0   : > { %v1785_v59 = vpack.c.bf16 %v1776_v37, %v1775_v56  ;;  %v1721_v58 = vadd.f32 %v1720_v26, %v1672_v55  ;;  %v1673_v60 = vpop.f32.mrf.mxu1  ;;  %v2490_v55 = vld [vmem:[%s3058_s20 + $0x38] sm:$0xff] }
 0x2a2   : > { %2273 = vmatmul.msk.bf16.gmra.mxu0 %vm1323_vm5, %v1785_v59  ;;  %v1742_v62 = vmul.f32 %v3529_v2, %v1721_v58 }
 0x2a4   : > { %v1761_v0 = vadd.f32 %v3535_v5, %v1742_v62 }
 0x2a5   : > { %v1624_v61 = vpop.f32.mrf.mxu3 }
 0x2a6   : > { %v1674_v38 = vadd.f32 %v1673_v60, %v1624_v61  ;;  %v1777_v3 = vmax.f32 %v1761_v0, 0.0  ;;  %v2491_v61 = vld [vmem:[%s3058_s20 + $0x40] sm:$0xff]  ;;  %v2492_v0 = vld [vmem:[%s3058_s20 + $0x48] sm:$0xff] }
 0x2a8   : > { %v1723_v63 = vadd.f32 %v1722_v39, %v1674_v38 }
 0x2aa   : > { %v1743_v10 = vmul.f32 %v3529_v2, %v1723_v63  ;;  %v3584_v2 = vld [vmem:[%s3810_s30] ss:$0 sm:$0xff]  ;;  %s2609_s30 = scalar_lea.hbm %s3812_s4, 512 }
 0x2ab   : > { %p2611_p9 = scmp.lt.s32.totalorder %s2609_s30, %s2605_s26 }
 0x2ac   : > { %v1762_v1 = vadd.f32 %v3535_v5, %v1743_v10 }
 0x2ad   : > { %p2612_p10 = por %p2611_p9, %p2610_p8 }
 0x2ae   : > { %v1778_v12 = vmax.f32 %v1762_v1, 0.0 }
 0x2af   : > { %p2613_p12 = pnand %p2612_p10, %p2608_p5 }
 0x2b0   : > { %v1786_v6 = vpack.c.bf16 %v1778_v12, %v1777_v3 }
 0x2b2   : > { %2274 = vmatmul.msk.bf16.gmra.mxu0 %vm1323_vm5, %v1786_v6 }
 0x2bf   : > { %v1832_v9 = vpop.f32.mrf.mxu0 }
 0x2c0   : > { %v1875_v13 = vmul.f32 %v3579_v7, %v1832_v9 }
 0x2c2   : > { %v1894_v5 = vadd.f32 %v3584_v2, %v1875_v13  ;;  %v2493_v13 = vld [vmem:[%s3058_s20 + $0x50] sm:$0xff] }
 0x2c4   : > { %v1910_v57 = vadd.f32 %v2483_v14, %v1894_v5 }
 0x2c6   : > { %v1926_v8 = vmax.f32 %v1910_v57, 0.0 }
 0x2c7   : > { %v1834_v15 = vpop.f32.mrf.mxu0 }
 0x2c8   : > { %1942 = vst [vmem:[%s3591_s14] sm:$0xff] %v1926_v8  ;;  %v1876_v16 = vmul.f32 %v3579_v7, %v1834_v15 }
 0x2ca   : > { %v1895_v17 = vadd.f32 %v3584_v2, %v1876_v16  ;;  %v2494_v16 = vld [vmem:[%s3058_s20 + $0x58] sm:$0xff] }
 0x2cc   : > { %v1911_v18 = vadd.f32 %v2484_v48, %v1895_v17 }
 0x2ce   : > { %v1927_v19 = vmax.f32 %v1911_v18, 0.0 }
 0x2cf   : > { %v1837_v20 = vpop.f32.mrf.mxu0 }
 0x2d0   : > { %1943 = vst [vmem:[%s3591_s14 + $0x8] sm:$0xff] %v1927_v19  ;;  %v1877_v45 = vmul.f32 %v3579_v7, %v1837_v20 }
 0x2d2   : > { %v1896_v21 = vadd.f32 %v3584_v2, %v1877_v45  ;;  %v2495_v45 = vld [vmem:[%s3058_s20 + $0x60] sm:$0xff] }
 0x2d4   : > { %v1912_v11 = vadd.f32 %v2485_v22, %v1896_v21 }
 0x2d6   : > { %v1928_v23 = vmax.f32 %v1912_v11, 0.0 }
 0x2d7   : > { %v1839_v25 = vpop.f32.mrf.mxu0 }
 0x2d8   : > { %1944 = vst [vmem:[%s3591_s14 + $0x10] sm:$0xff] %v1928_v23  ;;  %v1878_v24 = vmul.f32 %v3579_v7, %v1839_v25 }
 0x2da   : > { %v1897_v27 = vadd.f32 %v3584_v2, %v1878_v24  ;;  %v2496_v24 = vld [vmem:[%s3058_s20 + $0x68] sm:$0xff] }
 0x2dc   : > { %v1913_v30 = vadd.f32 %v2486_v29, %v1897_v27 }
 0x2de   : > { %v1929_v31 = vmax.f32 %v1913_v30, 0.0 }
 0x2df   : > { %v1842_v33 = vpop.f32.mrf.mxu0 }
 0x2e0   : > { %1945 = vst [vmem:[%s3591_s14 + $0x18] sm:$0xff] %v1929_v31  ;;  %v1879_v34 = vmul.f32 %v3579_v7, %v1842_v33 }
 0x2e2   : > { %v1898_v35 = vadd.f32 %v3584_v2, %v1879_v34  ;;  %v2497_v34 = vld [vmem:[%s3058_s20 + $0x70] sm:$0xff] }
 0x2e4   : > { %v1914_v52 = vadd.f32 %v2487_v36, %v1898_v35 }
 0x2e6   : > { %v1930_v40 = vmax.f32 %v1914_v52, 0.0 }
 0x2e7   : > { %v1844_v41 = vpop.f32.mrf.mxu0 }
 0x2e8   : > { %1946 = vst [vmem:[%s3591_s14 + $0x20] sm:$0xff] %v1930_v40  ;;  %v1880_v32 = vmul.f32 %v3579_v7, %v1844_v41 }
 0x2ea   : > { %v1899_v42 = vadd.f32 %v3584_v2, %v1880_v32  ;;  %v2498_v32 = vld [vmem:[%s3058_s20 + $0x78] sm:$0xff] }
 0x2ec   : > { %v1915_v44 = vadd.f32 %v2488_v4, %v1899_v42 }
 0x2ee   : > { %v1931_v46 = vmax.f32 %v1915_v44, 0.0 }
 0x2ef   : > { %v1847_v47 = vpop.f32.mrf.mxu0 }
 0x2f0   : > { %1947 = vst [vmem:[%s3591_s14 + $0x28] sm:$0xff] %v1931_v46  ;;  %v1881_v49 = vmul.f32 %v3579_v7, %v1847_v47 }
 0x2f2   : > { %v1900_v28 = vadd.f32 %v3584_v2, %v1881_v49 }
 0x2f4   : > { %v1916_v51 = vadd.f32 %v2489_v50, %v1900_v28 }
 0x2f6   : > { %v1932_v53 = vmax.f32 %v1916_v51, 0.0 }
 0x2f7   : > { %v1849_v43 = vpop.f32.mrf.mxu0 }
 0x2f8   : > { %1948 = vst [vmem:[%s3591_s14 + $0x30] sm:$0xff] %v1932_v53  ;;  %v1882_v26 = vmul.f32 %v3579_v7, %v1849_v43 }
 0x2fa   : > { %v1901_v54 = vadd.f32 %v3584_v2, %v1882_v26 }
 0x2fc   : > { %v1917_v56 = vadd.f32 %v2490_v55, %v1901_v54 }
 0x2fe   : > { %v1933_v37 = vmax.f32 %v1917_v56, 0.0 }
 0x2ff   : > { %v1852_v59 = vpop.f32.mrf.mxu0 }
 0x300   : > { %1949 = vst [vmem:[%s3591_s14 + $0x38] sm:$0xff] %v1933_v37  ;;  %v1883_v58 = vmul.f32 %v3579_v7, %v1852_v59 }
 0x302   : > { %v1902_v60 = vadd.f32 %v3584_v2, %v1883_v58 }
 0x304   : > { %v1918_v62 = vadd.f32 %v2491_v61, %v1902_v60 }
 0x306   : > { %v1934_v38 = vmax.f32 %v1918_v62, 0.0 }
 0x307   : > { %v1854_v39 = vpop.f32.mrf.mxu0 }
 0x308   : > { %1950 = vst [vmem:[%s3591_s14 + $0x40] sm:$0xff] %v1934_v38  ;;  %v1884_v63 = vmul.f32 %v3579_v7, %v1854_v39 }
 0x30a   : > { %v1903_v10 = vadd.f32 %v3584_v2, %v1884_v63 }
 0x30c   : > { %v1919_v1 = vadd.f32 %v2492_v0, %v1903_v10 }
 0x30e   : > { %v1935_v3 = vmax.f32 %v1919_v1, 0.0 }
 0x30f   : > { %v1857_v12 = vpop.f32.mrf.mxu0 }
 0x310   : > { %1951 = vst [vmem:[%s3591_s14 + $0x48] sm:$0xff] %v1935_v3  ;;  %v1885_v6 = vmul.f32 %v3579_v7, %v1857_v12 }
 0x312   : > { %v1904_v9 = vadd.f32 %v3584_v2, %v1885_v6 }
 0x314   : > { %v1920_v5 = vadd.f32 %v2493_v13, %v1904_v9 }
 0x316   : > { %v1936_v14 = vmax.f32 %v1920_v5, 0.0 }
 0x317   : > { %v1859_v57 = vpop.f32.mrf.mxu0 }
 0x318   : > { %1952 = vst [vmem:[%s3591_s14 + $0x50] sm:$0xff] %v1936_v14  ;;  %v1886_v8 = vmul.f32 %v3579_v7, %v1859_v57 }
 0x31a   : > { %v1905_v15 = vadd.f32 %v3584_v2, %v1886_v8 }
 0x31c   : > { %v1921_v17 = vadd.f32 %v2494_v16, %v1905_v15 }
 0x31e   : > { %v1937_v48 = vmax.f32 %v1921_v17, 0.0 }
 0x31f   : > { %v1862_v18 = vpop.f32.mrf.mxu0 }
 0x320   : > { %1953 = vst [vmem:[%s3591_s14 + $0x58] sm:$0xff] %v1937_v48  ;;  %v1887_v19 = vmul.f32 %v3579_v7, %v1862_v18 }
 0x322   : > { %v1906_v20 = vadd.f32 %v3584_v2, %v1887_v19 }
 0x324   : > { %v1922_v21 = vadd.f32 %v2495_v45, %v1906_v20 }
 0x326   : > { %v1938_v22 = vmax.f32 %v1922_v21, 0.0 }
 0x327   : > { %v1864_v11 = vpop.f32.mrf.mxu0 }
 0x328   : > { %1954 = vst [vmem:[%s3591_s14 + $0x60] sm:$0xff] %v1938_v22  ;;  %v1888_v23 = vmul.f32 %v3579_v7, %v1864_v11 }
 0x32a   : > { %v1907_v25 = vadd.f32 %v3584_v2, %v1888_v23 }
 0x32c   : > { %v1923_v27 = vadd.f32 %v2496_v24, %v1907_v25 }
 0x32e   : > { %v1939_v29 = vmax.f32 %v1923_v27, 0.0 }
 0x32f   : > { %v1867_v30 = vpop.f32.mrf.mxu0 }
 0x330   : > { %1955 = vst [vmem:[%s3591_s14 + $0x68] sm:$0xff] %v1939_v29  ;;  %v1889_v31 = vmul.f32 %v3579_v7, %v1867_v30 }
 0x332   : > { %v1908_v33 = vadd.f32 %v3584_v2, %v1889_v31 }
 0x334   : > { %v1924_v35 = vadd.f32 %v2497_v34, %v1908_v33 }
 0x336   : > { %v1940_v36 = vmax.f32 %v1924_v35, 0.0 }
 0x337   : > { %v1869_v52 = vpop.f32.mrf.mxu0 }
 0x338   : > { %1956 = vst [vmem:[%s3591_s14 + $0x70] sm:$0xff] %v1940_v36  ;;  %v1890_v40 = vmul.f32 %v3579_v7, %v1869_v52 }
 0x33a   : > { %v1909_v41 = vadd.f32 %v3584_v2, %v1890_v40 }
 0x33c   : > { %v1925_v42 = vadd.f32 %v2498_v32, %v1909_v41 }
 0x33e   : > { %v1941_v4 = vmax.f32 %v1925_v42, 0.0 }
 0x340   : > { %1957 = vst [vmem:[%s3591_s14 + $0x78] sm:$0xff] %v1941_v4 }
 0x341   : > { %2616 = shalt.err (!%p2613_p12)
}
 0x342   : > { %s2750_s19 = smov 128   ;;  %s2751_s20 = smov 8  }
 0x343   : > { %2340 = dma.vmem_to_hbm [thread:$0]  (%p2988_p4), %s1975_s0, 2048, %s1977_s27, %s1959_s17, %s2750_s19, %s2750_s19, %s2751_s20  }
 0x344 PF: > { %s3813_s14 = sld [smem:[#allocation14_spill]]  ;;  %p2357_p13 = scmp.ge.s32.totalorder %s2743_s16, 2 }
 0x346   : > { %p2353_p1 = pnand %p2357_p13, %p2992_p6 }
 0x348   : > { %p2354_p2 = pneg %p2353_p1 }
 0x34a   : > { %s1991_s9 = sand.u32 1, %s3813_s14  }
 0x34b   : > { %s1992_s6 = scalar_lea.sflag [#allocation4], %s1991_s9 }
 0x34c   : > { %2686 = dma.done.wait (%p2354_p2), %s1992_s6, 2048  }
 0x34d   : > { %2688 = vsyncadd (%p2354_p2), %s1992_s6, 4294965248  ;;  %s31_s16 = sadd.s32 1, %s2743_s16   ;;  %s3816_s7 = sld [smem:[#allocation13_spill]] }
 0x34e   : > { %p3676_p11 = scmp.ge.s32.totalorder %s31_s16, 6   ;;  %s3817_s26 = sld [smem:[#allocation23_spill]] }
 0x34f   : > { %s3818_s29 = sld [smem:[#allocation15_spill]]  ;;  %s3824_s21 = smov %s2695_s22 }
 0x350   : > { %s3819_s3 = sld [smem:[#allocation24_spill]]  ;;  %s3825_s22 = smov %s2699_s23 }
 0x351   : > { %s3820_s30 = sld [smem:[#allocation18_spill]]  ;;  %s3826_s23 = smov %s3035_s11 }
 0x352   : > { %s3821_s13 = sld [smem:[#allocation19_spill]]  ;;  %s3827_s24 = smov %s2707_s25 }
 0x353   : > { %s3822_s14 = sld [smem:[#allocation20_spill]]  ;;  %s3828_s25 = smov %s3816_s7 }
 0x354   : > { %s3823_s15 = sld [smem:[#allocation21_spill]]  ;;  %s3829_s27 = smov %s2719_s28 }
 0x355   : > { %s3830_s28 = smov %s3818_s29  ;;  %30 = sbr.rel (!%p3676_p11) target bundleno = 25 (0x19), region = 137 }
 0x356   : > { %s3831_s29 = smov %s3819_s3 }
 0x35a   :  { %1998 = vsyncpa [#allocation3], 1 }
 0x35b   :  { %2000 = vsyncpa [#allocation3 + $0x1], 1 }
 0x35c   :  { %2001 = vsyncpa [#allocation6], 1 }
 0x35d   :  { %2003 = vsyncpa [#allocation6 + $0x1], 1 }
 0x35e   :  { %2004 = vsyncpa [#allocation4], 1 }
 0x35f   :  { %2006 = vsyncpa [#allocation4 + $0x1], 1 }

</bundles_post_ra>
